<compile_context>
chip_gen: v5e
topology: v5e:2x2
jax: 0.10.0
libtpu: 0.0.40
codegen_flags: <defaults>
</compile_context>

<pallas_src>
import functools

import jax
import jax.numpy as jnp
from jax import lax
from jax.experimental import pallas as pl
from jax.experimental.pallas import tpu as pltpu

BN_EPS = 1e-5
LANE = 128
SUBLANE = 8


def _round_up(x: int, m: int) -> int:
    return (x + m - 1) // m * m


# ----------------------------------------------------------------------------
# Kernel
# ----------------------------------------------------------------------------
def make_mlp_kernel(num_hidden: int, batch: int, batch_padded: int):
    """Build the fused MLP kernel.

    Ref order:
      x, [W_i, gamma_i, beta_i] * num_hidden, W_out, b_out, o_ref

    Hidden Linear biases are folded away in the wrapper (they cancel exactly
    under train-mode BatchNorm).
    """
    need_row_mask = batch_padded != batch
    inv_b = 1.0 / float(batch)

    def kernel(*refs):
        x_ref = refs[0]
        h = x_ref[...]                     # bf16 [B_pad, in_pad]
        idx = 1

        if need_row_mask:
            row_ids = lax.broadcasted_iota(jnp.int32, (batch_padded, 1), 0)
            row_valid = row_ids < batch

        for _ in range(num_hidden):
            w = refs[idx][...]             # bf16 [in_pad, H_pad]
            gamma = refs[idx + 1][...]     # f32  [1, H_pad]
            beta = refs[idx + 2][...]      # f32  [1, H_pad]
            idx += 3

            # Linear (bias folded out: it cancels under train-mode BN).
            z = jnp.dot(h, w, preferred_element_type=jnp.float32)

            # One-pass batch statistics. Padded batch rows of h are exactly
            # zero, so they contribute nothing to the sums; divide by the
            # true batch size.
            s1 = jnp.sum(z, axis=0, keepdims=True)
            s2 = jnp.sum(z * z, axis=0, keepdims=True)
            mean = s1 * inv_b
            var = s2 * inv_b - mean * mean

            # Fold BN into a single affine, then ReLU.
            scale = gamma * lax.rsqrt(var + BN_EPS)
            shift = beta - mean * scale
            z = jnp.maximum(z * scale + shift, 0.0)

            if need_row_mask:
                # Keep padded batch rows exactly zero for the next layer's stats.
                z = jnp.where(row_valid, z, 0.0)

            # bf16 only at the MXU inputs; elementwise math stayed in f32.
            h = z.astype(jnp.bfloat16)

        w_out = refs[idx][...]             # bf16 [H_pad, out_pad]
        b_out = refs[idx + 1][...]         # f32  [1, out_pad]
        o_ref = refs[idx + 2]
        o_ref[...] = (jnp.dot(h, w_out, preferred_element_type=jnp.float32)
                      + b_out).astype(o_ref.dtype)

    return kernel


# ----------------------------------------------------------------------------
# Parameter init (PyTorch-Linear-like uniform ranges, logical shapes)
# ----------------------------------------------------------------------------
def init_params(key, hidden_dim_sizes, in_dim=28 * 28, out_dim=10):
    params = []
    current = in_dim
    for h in hidden_dim_sizes:
        key, kw, kb = jax.random.split(key, 3)
        bound = 1.0 / jnp.sqrt(current)
        w = jax.random.uniform(kw, (current, h), jnp.float32, -bound, bound)
        b = jax.random.uniform(kb, (1, h), jnp.float32, -bound, bound)
        gamma = jnp.ones((1, h), jnp.float32)   # BatchNorm1d weight init
        beta = jnp.zeros((1, h), jnp.float32)   # BatchNorm1d bias init
        params.extend([w, b, gamma, beta])
        current = h
    key, kw, kb = jax.random.split(key, 3)
    bound = 1.0 / jnp.sqrt(current)
    w_out = jax.random.uniform(kw, (current, out_dim), jnp.float32, -bound, bound)
    b_out = jax.random.uniform(kb, (1, out_dim), jnp.float32, -bound, bound)
    params.extend([w_out, b_out])
    return params


def pack_params(params, hidden_dim_sizes, in_dim, out_dim):
    """Pad to lane multiples, cast matmul operands to bf16, drop hidden biases."""
    packed = []
    cur, cur_pad = in_dim, _round_up(in_dim, LANE)
    idx = 0
    for h in hidden_dim_sizes:
        w, _b, gamma, beta = params[idx:idx + 4]   # hidden bias _b cancels under BN
        idx += 4
        h_pad = _round_up(h, LANE)
        w_p = jnp.zeros((cur_pad, h_pad), jnp.float32).at[:cur, :h].set(w)
        g_p = jnp.zeros((1, h_pad), jnp.float32).at[:, :h].set(gamma.reshape(1, -1))
        be_p = jnp.zeros((1, h_pad), jnp.float32).at[:, :h].set(beta.reshape(1, -1))
        packed.extend([w_p.astype(jnp.bfloat16), g_p, be_p])
        cur, cur_pad = h, h_pad
    w_out, b_out = params[idx], params[idx + 1]
    out_pad = _round_up(out_dim, LANE)
    w_p = jnp.zeros((cur_pad, out_pad), jnp.float32).at[:cur, :out_dim].set(w_out)
    b_p = jnp.zeros((1, out_pad), jnp.float32).at[:, :out_dim].set(b_out.reshape(1, -1))
    packed.extend([w_p.astype(jnp.bfloat16), b_p])
    return packed


# ----------------------------------------------------------------------------
# Forward wrapper
# ----------------------------------------------------------------------------
@functools.partial(jax.jit, static_argnames=("hidden_dim_sizes",))
def mlp_forward(x_nchw, params, hidden_dim_sizes):
    num_hidden = len(hidden_dim_sizes)
    B = x_nchw.shape[0]
    in_dim = 1
    for d in x_nchw.shape[1:]:
        in_dim *= d
    out_dim = params[-1].shape[-1]

    B_pad = _round_up(max(B, SUBLANE), SUBLANE)
    in_pad = _round_up(in_dim, LANE)
    out_pad = _round_up(out_dim, LANE)

    # nn.Flatten() + zero-pad batch/feature dims + bf16 for the MXU.
    x_flat = x_nchw.reshape(B, -1).astype(jnp.bfloat16)
    x_pad = jnp.pad(x_flat, ((0, B_pad - B), (0, in_pad - in_dim)))

    packed = pack_params(params, hidden_dim_sizes, in_dim, out_dim)
    n_in = 1 + len(packed)

    kernel = make_mlp_kernel(num_hidden, B, B_pad)

    # Advisory cost estimate for XLA scheduling.
    dims = [in_pad] + [_round_up(h, LANE) for h in hidden_dim_sizes] + [out_pad]
    flops = 2 * B_pad * sum(dims[i] * dims[i + 1] for i in range(len(dims) - 1))
    transcendentals = int(sum(dims[1:-1]))  # one rsqrt per hidden feature
    bytes_accessed = (x_pad.size * 2
                      + sum(int(p.size) * p.dtype.itemsize for p in packed)
                      + B_pad * out_pad * 4)

    out_full = pl.pallas_call(
        kernel,
        out_shape=jax.ShapeDtypeStruct((B_pad, out_pad), jnp.float32),
        in_specs=[pl.BlockSpec(memory_space=pltpu.MemorySpace.VMEM)] * n_in,
        out_specs=pl.BlockSpec(memory_space=pltpu.MemorySpace.VMEM),
        compiler_params=pltpu.CompilerParams(vmem_limit_bytes=64 * 1024 * 1024),
        cost_estimate=pl.CostEstimate(flops=flops,
                                      transcendentals=transcendentals,
                                      bytes_accessed=bytes_accessed),
    )(x_pad, *packed)

    # Slice the real batch rows / 10 logit columns back out (plain JAX glue).
    return out_full[:B, :out_dim]


# ----------------------------------------------------------------------------
# References
# ----------------------------------------------------------------------------
def mlp_ref_f32(x_nchw, params, num_hidden):
    """Exact PyTorch-semantics reference in f32 (train-mode BN, biased var)."""
    h = x_nchw.reshape(x_nchw.shape[0], -1).astype(jnp.float32)
    idx = 0
    for _ in range(num_hidden):
        w, b, gamma, beta = params[idx:idx + 4]
        idx += 4
        h = h @ w + b
        mean = jnp.mean(h, axis=0, keepdims=True)
        var = jnp.mean((h - mean) ** 2, axis=0, keepdims=True)
        h = (h - mean) / jnp.sqrt(var + BN_EPS) * gamma + beta
        h = jnp.maximum(h, 0.0)
    w_out, b_out = params[idx], params[idx + 1]
    return h @ w_out + b_out


def mlp_ref_kernel_numerics(x_nchw, params, num_hidden):
    """Reference that mirrors the kernel's numerics (bf16 matmuls, folded BN)."""
    B = x_nchw.shape[0]
    h = x_nchw.reshape(B, -1).astype(jnp.bfloat16)
    idx = 0
    for _ in range(num_hidden):
        w, _b, gamma, beta = params[idx:idx + 4]
        idx += 4
        z = jnp.dot(h, w.astype(jnp.bfloat16), preferred_element_type=jnp.float32)
        mean = jnp.sum(z, axis=0, keepdims=True) / B
        var = jnp.sum(z * z, axis=0, keepdims=True) / B - mean * mean
        scale = gamma * lax.rsqrt(var + BN_EPS)
        shift = beta - mean * scale
        z = jnp.maximum(z * scale + shift, 0.0)
        h = z.astype(jnp.bfloat16)
    w_out, b_out = params[idx], params[idx + 1]
    return jnp.dot(h, w_out.astype(jnp.bfloat16),
                   preferred_element_type=jnp.float32) + b_out


# ----------------------------------------------------------------------------
if __name__ == "__main__":
    hidden_dim_sizes = (32, 32)   # MLP(hidden_dim_sizes=[32, 32], use_bn=True)
    num_hidden = len(hidden_dim_sizes)

    key = jax.random.PRNGKey(0)
    key, kx, kp = jax.random.split(key, 3)

    B = 128   # fills the MXU M dimension / sublanes
    x = jax.random.normal(kx, (B, 1, 28, 28), jnp.float32)  # NCHW, MNIST-like
    params = init_params(kp, hidden_dim_sizes)

    out = mlp_forward(x, params, hidden_dim_sizes)
    out = jax.block_until_ready(out)
    assert out.shape == (B, 10), out.shape

    # Tight check vs. a reference with matched numerics (kernel logic is exact).
    ref_bf16 = mlp_ref_kernel_numerics(x, params, num_hidden)
    assert jnp.allclose(out, ref_bf16, atol=2e-3, rtol=2e-3), \
        float(jnp.max(jnp.abs(out - ref_bf16)))

    # Loose check vs. the exact f32 PyTorch semantics (bf16 MXU approximation).
    ref_f32 = mlp_ref_f32(x, params, num_hidden)
    assert jnp.allclose(out, ref_f32, atol=0.25, rtol=0.0), \
        float(jnp.max(jnp.abs(out - ref_f32)))

    print("KERNEL_OK")
</pallas_src>

<mosaic_0001>
module attributes {stable_mosaic.version = 11 : i64} {
  func.func @kernel(%arg0: memref<128x896xbf16, #tpu.memory_space<vmem>>, %arg1: memref<896x128xbf16, #tpu.memory_space<vmem>>, %arg2: memref<1x128xf32, #tpu.memory_space<vmem>>, %arg3: memref<1x128xf32, #tpu.memory_space<vmem>>, %arg4: memref<128x128xbf16, #tpu.memory_space<vmem>>, %arg5: memref<1x128xf32, #tpu.memory_space<vmem>>, %arg6: memref<1x128xf32, #tpu.memory_space<vmem>>, %arg7: memref<128x128xbf16, #tpu.memory_space<vmem>>, %arg8: memref<1x128xf32, #tpu.memory_space<vmem>>, %arg9: memref<128x128xf32, #tpu.memory_space<vmem>>) attributes {dimension_semantics = [], scalar_prefetch = 0 : i64, scratch_operands = 0 : i64, tpu.core_type = #tpu.core_type<tc>} {
    %c0 = arith.constant 0 : index
    %c0_0 = arith.constant 0 : index
    %0 = vector.load %arg0[%c0, %c0_0] : memref<128x896xbf16, #tpu.memory_space<vmem>>, vector<128x896xbf16>
    %c0_1 = arith.constant 0 : index
    %c0_2 = arith.constant 0 : index
    %1 = vector.load %arg1[%c0_1, %c0_2] : memref<896x128xbf16, #tpu.memory_space<vmem>>, vector<896x128xbf16>
    %c0_3 = arith.constant 0 : index
    %c0_4 = arith.constant 0 : index
    %2 = vector.load %arg2[%c0_3, %c0_4] : memref<1x128xf32, #tpu.memory_space<vmem>>, vector<1x128xf32>
    %c0_5 = arith.constant 0 : index
    %c0_6 = arith.constant 0 : index
    %3 = vector.load %arg3[%c0_5, %c0_6] : memref<1x128xf32, #tpu.memory_space<vmem>>, vector<1x128xf32>
    %cst = arith.constant dense<0.000000e+00> : vector<128x128xf32>
    %4 = tpu.matmul %0, %1, %cst {dimension_numbers = #tpu.dot_dimension_numbers<[1], [0], [0], [1], [0, 0, 1, 1], [], []>} : vector<128x896xbf16>, vector<896x128xbf16>, vector<128x128xf32> -> vector<128x128xf32>
    %cst_7 = arith.constant dense<0.000000e+00> : vector<128xf32>
    %5 = vector.multi_reduction <add>, %4, %cst_7 [0] : vector<128x128xf32> to vector<128xf32>
    %6 = vector.shape_cast %5 : vector<128xf32> to vector<1x128xf32>
    %7 = arith.mulf %4, %4 : vector<128x128xf32>
    %cst_8 = arith.constant dense<0.000000e+00> : vector<128xf32>
    %8 = vector.multi_reduction <add>, %7, %cst_8 [0] : vector<128x128xf32> to vector<128xf32>
    %9 = vector.shape_cast %8 : vector<128xf32> to vector<1x128xf32>
    %cst_9 = arith.constant 7.812500e-03 : f32
    %10 = vector.broadcast %cst_9 : f32 to vector<1x128xf32>
    %11 = arith.mulf %6, %10 : vector<1x128xf32>
    %cst_10 = arith.constant 7.812500e-03 : f32
    %12 = vector.broadcast %cst_10 : f32 to vector<1x128xf32>
    %13 = arith.mulf %9, %12 : vector<1x128xf32>
    %14 = arith.mulf %11, %11 : vector<1x128xf32>
    %15 = arith.subf %13, %14 : vector<1x128xf32>
    %cst_11 = arith.constant 9.99999974E-6 : f32
    %16 = vector.broadcast %cst_11 : f32 to vector<1x128xf32>
    %17 = arith.addf %15, %16 : vector<1x128xf32>
    %18 = math.rsqrt %17 : vector<1x128xf32>
    %19 = arith.mulf %2, %18 : vector<1x128xf32>
    %20 = arith.mulf %11, %19 : vector<1x128xf32>
    %21 = arith.subf %3, %20 : vector<1x128xf32>
    %22 = vector.broadcast %19 : vector<1x128xf32> to vector<128x128xf32>
    %23 = arith.mulf %4, %22 : vector<128x128xf32>
    %24 = vector.broadcast %21 : vector<1x128xf32> to vector<128x128xf32>
    %25 = arith.addf %23, %24 : vector<128x128xf32>
    %cst_12 = arith.constant 0.000000e+00 : f32
    %26 = vector.broadcast %cst_12 : f32 to vector<128x128xf32>
    %27 = arith.maximumf %25, %26 : vector<128x128xf32>
    %28 = arith.truncf %27 : vector<128x128xf32> to vector<128x128xbf16>
    %c0_13 = arith.constant 0 : index
    %c0_14 = arith.constant 0 : index
    %29 = vector.load %arg4[%c0_13, %c0_14] : memref<128x128xbf16, #tpu.memory_space<vmem>>, vector<128x128xbf16>
    %c0_15 = arith.constant 0 : index
    %c0_16 = arith.constant 0 : index
    %30 = vector.load %arg5[%c0_15, %c0_16] : memref<1x128xf32, #tpu.memory_space<vmem>>, vector<1x128xf32>
    %c0_17 = arith.constant 0 : index
    %c0_18 = arith.constant 0 : index
    %31 = vector.load %arg6[%c0_17, %c0_18] : memref<1x128xf32, #tpu.memory_space<vmem>>, vector<1x128xf32>
    %cst_19 = arith.constant dense<0.000000e+00> : vector<128x128xf32>
    %32 = tpu.matmul %28, %29, %cst_19 {dimension_numbers = #tpu.dot_dimension_numbers<[1], [0], [0], [1], [0, 0, 1, 1], [], []>} : vector<128x128xbf16>, vector<128x128xbf16>, vector<128x128xf32> -> vector<128x128xf32>
    %cst_20 = arith.constant dense<0.000000e+00> : vector<128xf32>
    %33 = vector.multi_reduction <add>, %32, %cst_20 [0] : vector<128x128xf32> to vector<128xf32>
    %34 = vector.shape_cast %33 : vector<128xf32> to vector<1x128xf32>
    %35 = arith.mulf %32, %32 : vector<128x128xf32>
    %cst_21 = arith.constant dense<0.000000e+00> : vector<128xf32>
    %36 = vector.multi_reduction <add>, %35, %cst_21 [0] : vector<128x128xf32> to vector<128xf32>
    %37 = vector.shape_cast %36 : vector<128xf32> to vector<1x128xf32>
    %cst_22 = arith.constant 7.812500e-03 : f32
    %38 = vector.broadcast %cst_22 : f32 to vector<1x128xf32>
    %39 = arith.mulf %34, %38 : vector<1x128xf32>
    %cst_23 = arith.constant 7.812500e-03 : f32
    %40 = vector.broadcast %cst_23 : f32 to vector<1x128xf32>
    %41 = arith.mulf %37, %40 : vector<1x128xf32>
    %42 = arith.mulf %39, %39 : vector<1x128xf32>
    %43 = arith.subf %41, %42 : vector<1x128xf32>
    %cst_24 = arith.constant 9.99999974E-6 : f32
    %44 = vector.broadcast %cst_24 : f32 to vector<1x128xf32>
    %45 = arith.addf %43, %44 : vector<1x128xf32>
    %46 = math.rsqrt %45 : vector<1x128xf32>
    %47 = arith.mulf %30, %46 : vector<1x128xf32>
    %48 = arith.mulf %39, %47 : vector<1x128xf32>
    %49 = arith.subf %31, %48 : vector<1x128xf32>
    %50 = vector.broadcast %47 : vector<1x128xf32> to vector<128x128xf32>
    %51 = arith.mulf %32, %50 : vector<128x128xf32>
    %52 = vector.broadcast %49 : vector<1x128xf32> to vector<128x128xf32>
    %53 = arith.addf %51, %52 : vector<128x128xf32>
    %cst_25 = arith.constant 0.000000e+00 : f32
    %54 = vector.broadcast %cst_25 : f32 to vector<128x128xf32>
    %55 = arith.maximumf %53, %54 : vector<128x128xf32>
    %56 = arith.truncf %55 : vector<128x128xf32> to vector<128x128xbf16>
    %c0_26 = arith.constant 0 : index
    %c0_27 = arith.constant 0 : index
    %57 = vector.load %arg7[%c0_26, %c0_27] : memref<128x128xbf16, #tpu.memory_space<vmem>>, vector<128x128xbf16>
    %c0_28 = arith.constant 0 : index
    %c0_29 = arith.constant 0 : index
    %58 = vector.load %arg8[%c0_28, %c0_29] : memref<1x128xf32, #tpu.memory_space<vmem>>, vector<1x128xf32>
    %cst_30 = arith.constant dense<0.000000e+00> : vector<128x128xf32>
    %59 = tpu.matmul %56, %57, %cst_30 {dimension_numbers = #tpu.dot_dimension_numbers<[1], [0], [0], [1], [0, 0, 1, 1], [], []>} : vector<128x128xbf16>, vector<128x128xbf16>, vector<128x128xf32> -> vector<128x128xf32>
    %60 = vector.broadcast %58 : vector<1x128xf32> to vector<128x128xf32>
    %61 = arith.addf %59, %60 : vector<128x128xf32>
    %c0_31 = arith.constant 0 : index
    %c0_32 = arith.constant 0 : index
    %62 = vector.load %arg9[%c0_31, %c0_32] : memref<128x128xf32, #tpu.memory_space<vmem>>, vector<128x128xf32>
    tpu.vector_store %arg9[%c0_31, %c0_32], %61 {strides = array<i32>} : memref<128x128xf32, #tpu.memory_space<vmem>>, vector<128x128xf32>,
    return
  }
}

</mosaic_0001>

<bundles_post_ra>
// kernel: mlp_forward.1
= control target key start
LH: loop header
LB: loop body
LE: loop exit
PB: predicated region body
PF: predicated region fallthrough
CT: control target
= control target key end

     0   :  { %s3327_s1 = inlined_call_operand.vmem [shape: bf16[896,128], index: 1, kind: input, shape index: {}]   ;;  %s3328_s0 = inlined_call_operand.vmem [shape: bf16[128,896], index: 0, kind: input, shape index: {}]   ;;  %s3329_s4 = inlined_call_operand.vmem [shape: bf16[128,128], index: 4, kind: input, shape index: {}]   ;;  %s3330_s2 = inlined_call_operand.vmem [shape: f32[1,128], index: 2, kind: input, shape index: {}]   ;;  %s3331_s3 = inlined_call_operand.vmem [shape: f32[1,128], index: 3, kind: input, shape index: {}]   ;;  %s3332_s7 = inlined_call_operand.vmem [shape: bf16[128,128], index: 7, kind: input, shape index: {}]   ;;  %s3333_s5 = inlined_call_operand.vmem [shape: f32[1,128], index: 5, kind: input, shape index: {}]   ;;  %s3334_s6 = inlined_call_operand.vmem [shape: f32[1,128], index: 6, kind: input, shape index: {}]   ;;  %s3335_s8 = inlined_call_operand.vmem [shape: f32[1,128], index: 8, kind: input, shape index: {}]   ;;  %s3336_s9 = inlined_call_operand.vmem [shape: f32[128,128], index: 9, kind: output, shape index: {}]  }
   0x1   :  { %v2280_v0 = vld [vmem:[%s3327_s1 + $0x38] sm:$0xff]  ;;  %v2279_v1 = vld [vmem:[%s3327_s1 + $0x30] sm:$0xff]  ;;  %v2278_v2 = vld [vmem:[%s3327_s1 + $0x28] sm:$0xff] }
   0x2   :  { %2345 = vmatpush.bf16.msra.mxu1 %v2280_v0  ;;  %2346 = vmatpush.bf16.msra.mxu2 %v2280_v0  ;;  %v2277_v3 = vld [vmem:[%s3327_s1 + $0x20] sm:$0xff]  ;;  %v2276_v4 = vld [vmem:[%s3327_s1 + $0x18] sm:$0xff]  ;;  %v2275_v5 = vld [vmem:[%s3327_s1 + $0x10] sm:$0xff] }
   0x3   :  { %2347 = vmatpush.bf16.msra.mxu3 %v2280_v0  ;;  %834 = vmatpush.bf16.msra.mxu0 %v2280_v0  ;;  %v2274_v6 = vld [vmem:[%s3327_s1 + $0x8] sm:$0xff]  ;;  %v2273_v7 = vld [vmem:[%s3327_s1] sm:$0xff]  ;;  %v1763_v8 = vld [vmem:[%s3328_s0 + $0x70] sm:$0xf] }
   0x4   :  { %v2234_v9 = vld [vmem:[%s3328_s0 + $0x88] sm:$0xf0]  ;;  %v1819_v10 = vld [vmem:[%s3328_s0 + $0xe0] sm:$0xf]  ;;  %v2248_v11 = vld [vmem:[%s3328_s0 + $0xf8] sm:$0xf0] }
   0x5   :  { %v2296_v12 = vld [vmem:[%s3327_s1 + $0xb8] sm:$0xff]  ;;  %v1875_v13 = vld [vmem:[%s3328_s0 + $0x150] sm:$0xf]  ;;  %v2262_v14 = vld [vmem:[%s3328_s0 + $0x168] sm:$0xf0]  ;;  %v1764_v17 = vor.u32 %v2234_v9, %v1763_v8  ;;  %v1820_v18 = vor.u32 %v2248_v11, %v1819_v10 }
   0x6   :  { %2348 = vmatpush.bf16.msra.mxu1 %v2279_v1  ;;  %2349 = vmatpush.bf16.msra.mxu2 %v2279_v1  ;;  %v2288_v15 = vld [vmem:[%s3327_s1 + $0x78] sm:$0xff]  ;;  %v1876_v19 = vor.u32 %v2262_v14, %v1875_v13  ;;  %v1707_v20 = vld [vmem:[%s3328_s0] sm:$0xf]  ;;  %v2295_v22 = vld [vmem:[%s3327_s1 + $0xb0] sm:$0xff] }
   0x7   :  { %2350 = vmatpush.bf16.msra.mxu3 %v2279_v1  ;;  %835 = vmatpush.bf16.msra.mxu0 %v2279_v1  ;;  %v2304_v16 = vld [vmem:[%s3327_s1 + $0xf8] sm:$0xff]  ;;  %v2287_v24 = vld [vmem:[%s3327_s1 + $0x70] sm:$0xff]  ;;  %v2294_v27 = vld [vmem:[%s3327_s1 + $0xa8] sm:$0xff] }
   0x8   :  { %v2220_v21 = vld [vmem:[%s3328_s0 + $0x18] sm:$0xf0]  ;;  %v2303_v25 = vld [vmem:[%s3327_s1 + $0xf0] sm:$0xff]  ;;  %v2286_v29 = vld [vmem:[%s3327_s1 + $0x68] sm:$0xff] }
   0x9   :  { %v2312_v23 = vld [vmem:[%s3327_s1 + $0x138] sm:$0xff]  ;;  %v1708_v26 = vor.u32 %v2220_v21, %v1707_v20  ;;  %v2311_v28 = vld [vmem:[%s3327_s1 + $0x130] sm:$0xff]  ;;  %v2302_v30 = vld [vmem:[%s3327_s1 + $0xe8] sm:$0xff] }
   0xa   :  { %2351 = vmatpush.bf16.msra.mxu1 %v2278_v2  ;;  %2352 = vmatpush.bf16.msra.mxu2 %v2278_v2  ;;  %v2293_v31 = vld [vmem:[%s3327_s1 + $0xa0] sm:$0xff]  ;;  %v2310_v32 = vld [vmem:[%s3327_s1 + $0x128] sm:$0xff]  ;;  %v1847_v37 = vld [vmem:[%s3328_s0 + $0x118] sm:$0xf] }
   0xb   :  { %2353 = vmatpush.bf16.msra.mxu3 %v2278_v2  ;;  %836 = vmatpush.bf16.msra.mxu0 %v2278_v2  ;;  %v2285_v33 = vld [vmem:[%s3327_s1 + $0x60] sm:$0xff]  ;;  %v1791_v35 = vld [vmem:[%s3328_s0 + $0xa8] sm:$0xf]  ;;  %v2255_v38 = vld [vmem:[%s3328_s0 + $0x130] sm:$0xf0] }
   0xc   :  { %v2301_v34 = vld [vmem:[%s3327_s1 + $0xe0] sm:$0xff]  ;;  %v2292_v39 = vld [vmem:[%s3327_s1 + $0x98] sm:$0xff]  ;;  %v1903_v40 = vld [vmem:[%s3328_s0 + $0x188] sm:$0xf]  ;;  %v1848_v46 = vor.u32 %v2255_v38, %v1847_v37 }
   0xd   :  { %v2241_v36 = vld [vmem:[%s3328_s0 + $0xc0] sm:$0xf0]  ;;  %v2284_v43 = vld [vmem:[%s3327_s1 + $0x58] sm:$0xff]  ;;  %v2227_v49 = vld [vmem:[%s3328_s0 + $0x50] sm:$0xf0] }
   0xe   :  { %2354 = vmatpush.bf16.msra.mxu1 %v2277_v3  ;;  %2355 = vmatpush.bf16.msra.mxu2 %v2277_v3  ;;  %v2269_v41 = vld [vmem:[%s3328_s0 + $0x1a0] sm:$0xf0]  ;;  %v2300_v44 = vld [vmem:[%s3327_s1 + $0xd8] sm:$0xff]  ;;  %v1792_v45 = vor.u32 %v2241_v36, %v1791_v35  ;;  %v2291_v50 = vld [vmem:[%s3327_s1 + $0x90] sm:$0xff] }
   0xf   :  { %2356 = vmatpush.bf16.msra.mxu3 %v2277_v3  ;;  %837 = vmatpush.bf16.msra.mxu0 %v2277_v3  ;;  %v2309_v42 = vld [vmem:[%s3327_s1 + $0x120] sm:$0xff]  ;;  %v1904_v47 = vor.u32 %v2269_v41, %v1903_v40  ;;  %v1735_v48 = vld [vmem:[%s3328_s0 + $0x38] sm:$0xf]  ;;  %v2283_v52 = vld [vmem:[%s3327_s1 + $0x50] sm:$0xff] }
  0x10   :  { %v2308_v51 = vld [vmem:[%s3327_s1 + $0x118] sm:$0xff]  ;;  %v2299_v53 = vld [vmem:[%s3327_s1 + $0xd0] sm:$0xff]  ;;  %v1736_v54 = vor.u32 %v2227_v49, %v1735_v48  ;;  %v2290_v55 = vld [vmem:[%s3327_s1 + $0x88] sm:$0xff] }
  0x11   :  { %v2307_v56 = vld [vmem:[%s3327_s1 + $0x110] sm:$0xff]  ;;  %v2282_v57 = vld [vmem:[%s3327_s1 + $0x48] sm:$0xff]  ;;  %v2289_v59 = vld [vmem:[%s3327_s1 + $0x80] sm:$0xff] }
  0x12   :  { %2357 = vmatpush.bf16.msra.mxu1 %v2276_v4  ;;  %2358 = vmatpush.bf16.msra.mxu2 %v2276_v4  ;;  %v2298_v58 = vld [vmem:[%s3327_s1 + $0xc8] sm:$0xff]  ;;  %v2281_v61 = vld [vmem:[%s3327_s1 + $0x40] sm:$0xff]  ;;  %v2328_v0 = vld [vmem:[%s3327_s1 + $0x1b8] sm:$0xff] }
  0x13   :  { %2359 = vmatpush.bf16.msra.mxu3 %v2276_v4  ;;  %838 = vmatpush.bf16.msra.mxu0 %v2276_v4  ;;  %v2306_v60 = vld [vmem:[%s3327_s1 + $0x108] sm:$0xff]  ;;  %v2297_v62 = vld [vmem:[%s3327_s1 + $0xc0] sm:$0xff]  ;;  %v2320_v1 = vld [vmem:[%s3327_s1 + $0x178] sm:$0xff] }
  0x14   :  { %v2217_v63 = vld [vmem:[%s3328_s0 + $0x4] sm:$0xf]  ;;  %v1709_v2 = vld [vmem:[%s3328_s0 + $0x1c] sm:$0xf0]  ;;  %v1715_v3 = vld [vmem:[%s3328_s0 + $0x8] sm:$0xf] }
  0x15   :  { %v2221_v4 = vld [vmem:[%s3328_s0 + $0x20] sm:$0xf0]  ;;  %v1712_v8 = vor.u32 %v2217_v63, %v1709_v2  ;;  %v1723_v11 = vld [vmem:[%s3328_s0 + $0x10] sm:$0xf]  ;;  %v1743_v20 = vld [vmem:[%s3328_s0 + $0x40] sm:$0xf] }
  0x16   :  { %2360 = vmatpush.bf16.msra.mxu1 %v2275_v5  ;;  %2361 = vmatpush.bf16.msra.mxu2 %v2275_v5  ;;  %v1716_v9 = vor.u32 %v2221_v4, %v1715_v3  ;;  %v2327_v13 = vld [vmem:[%s3327_s1 + $0x1b0] sm:$0xff]  ;;  %v2228_v21 = vld [vmem:[%s3328_s0 + $0x58] sm:$0xf0]  ;;  %v1773_v37 = vld [vmem:[%s3328_s0 + $0x94] sm:$0xf0] }
  0x17   :  { %2362 = vmatpush.bf16.msra.mxu3 %v2275_v5  ;;  %839 = vmatpush.bf16.msra.mxu0 %v2275_v5  ;;  %v2218_v5 = vld [vmem:[%s3328_s0 + $0xc] sm:$0xf]  ;;  %v2319_v14 = vld [vmem:[%s3327_s1 + $0x170] sm:$0xff]  ;;  %v2232_v36 = vld [vmem:[%s3328_s0 + $0x7c] sm:$0xf] }
  0x18   :  { %v2235_v35 = vld [vmem:[%s3328_s0 + $0x90] sm:$0xf0]  ;;  %v1776_v40 = vor.u32 %v2232_v36, %v1773_v37  ;;  %v1779_v41 = vld [vmem:[%s3328_s0 + $0x80] sm:$0xf]  ;;  %v1799_v48 = vld [vmem:[%s3328_s0 + $0xb0] sm:$0xf] }
  0x19   :  { %v2242_v49 = vld [vmem:[%s3328_s0 + $0xc8] sm:$0xf0]  ;;  %v2249_v63 = vld [vmem:[%s3328_s0 + $0x100] sm:$0xf0] }
  0x1a   :  { %2363 = vmatpush.bf16.msra.mxu1 %v2274_v6  ;;  %2364 = vmatpush.bf16.msra.mxu2 %v2274_v6 }
  0x1b   :  { %2365 = vmatpush.bf16.msra.mxu3 %v2274_v6  ;;  %840 = vmatpush.bf16.msra.mxu0 %v2274_v6  ;;  %v1717_v6 = vld [vmem:[%s3328_s0 + $0x24] sm:$0xf0] }
  0x1c   :  { %v1720_v10 = vor.u32 %v2218_v5, %v1717_v6  ;;  %v1835_v5 = vld [vmem:[%s3328_s0 + $0xf0] sm:$0xf]  ;;  %v2250_v6 = vld [vmem:[%s3328_s0 + $0x108] sm:$0xf0] }
  0x1e   :  { %2366 = vmatpush.bf16.msra.mxu1 %v2273_v7  ;;  %2367 = vmatpush.bf16.msra.mxu2 %v2273_v7 }
  0x1f   :  { %2368 = vmatpush.bf16.msra.mxu3 %v2273_v7  ;;  %841 = vmatpush.bf16.msra.mxu0 %v2273_v7  ;;  %v2305_v7 = vld [vmem:[%s3327_s1 + $0x100] sm:$0xff] }
  0x21   :  { %852 = vmatmul.bf16.vlgmr.msra.gmra.mxu1 %v1764_v17  ;;  %862 = vmatmul.bf16.vlgmr.msra.gmra.mxu2 %v1820_v18  ;;  %v2318_v17 = vld [vmem:[%s3327_s1 + $0x168] sm:$0xff]  ;;  %v2224_v18 = vld [vmem:[%s3328_s0 + $0x3c] sm:$0xf] }
  0x22   :  { %932 = vmatpush.bf16.msrb.mxu2 %v2296_v12  ;;  %883 = vmatpush.bf16.msrb.mxu1 %v2288_v15  ;;  %v2222_v12 = vld [vmem:[%s3328_s0 + $0x28] sm:$0xf0] }
  0x23   :  { %981 = vmatpush.bf16.msrb.mxu3 %v2304_v16  ;;  %1030 = vmatpush.bf16.msrb.mxu0 %v2312_v23  ;;  %v1724_v15 = vor.u32 %v2222_v12, %v1723_v11  ;;  %v2326_v16 = vld [vmem:[%s3327_s1 + $0x1a8] sm:$0xff]  ;;  %v1745_v23 = vld [vmem:[%s3328_s0 + $0x5c] sm:$0xf0]  ;;  %v1849_v11 = vld [vmem:[%s3328_s0 + $0x134] sm:$0xf0] }
  0x24   :  { %872 = vmatmul.bf16.vlgmr.msra.gmra.mxu3 %v1876_v19  ;;  %842 = vmatmul.bf16.vlgmr.msra.gmra.mxu0 %v1708_v26  ;;  %v1737_v19 = vld [vmem:[%s3328_s0 + $0x54] sm:$0xf0]  ;;  %v1855_v12 = vld [vmem:[%s3328_s0 + $0x120] sm:$0xf] }
  0x26   :  { %933 = vmatpush.bf16.msrb.mxu2 %v2295_v22  ;;  %884 = vmatpush.bf16.msrb.mxu1 %v2287_v24  ;;  %v2225_v22 = vld [vmem:[%s3328_s0 + $0x44] sm:$0xf]  ;;  %v1740_v24 = vor.u32 %v2224_v18, %v1737_v19  ;;  %v1863_v19 = vld [vmem:[%s3328_s0 + $0x128] sm:$0xf] }
  0x27   :  { %982 = vmatpush.bf16.msrb.mxu3 %v2303_v25  ;;  %1031 = vmatpush.bf16.msrb.mxu0 %v2311_v28  ;;  %v1744_v25 = vor.u32 %v2228_v21, %v1743_v20  ;;  %v1748_v26 = vor.u32 %v2225_v22, %v1745_v23  ;;  %v2229_v28 = vld [vmem:[%s3328_s0 + $0x60] sm:$0xf0] }
  0x28   :  { %v2257_v20 = vld [vmem:[%s3328_s0 + $0x140] sm:$0xf0] }
  0x29   :  { %v1864_v21 = vor.u32 %v2257_v20, %v1863_v19  ;;  %v2321_v22 = vld [vmem:[%s3327_s1 + $0x180] sm:$0xff]  ;;  %v2230_v19 = vld [vmem:[%s3328_s0 + $0x68] sm:$0xf0] }
  0x2a   :  { %934 = vmatpush.bf16.msrb.mxu2 %v2294_v27  ;;  %885 = vmatpush.bf16.msrb.mxu1 %v2286_v29  ;;  %v1751_v27 = vld [vmem:[%s3328_s0 + $0x48] sm:$0xf]  ;;  %v2313_v23 = vld [vmem:[%s3327_s1 + $0x140] sm:$0xff] }
  0x2b   :  { %983 = vmatpush.bf16.msrb.mxu3 %v2302_v30  ;;  %1032 = vmatpush.bf16.msrb.mxu0 %v2310_v32  ;;  %v1752_v29 = vor.u32 %v2229_v28, %v1751_v27  ;;  %v2325_v30 = vld [vmem:[%s3327_s1 + $0x1a0] sm:$0xff]  ;;  %v2231_v32 = vld [vmem:[%s3328_s0 + $0x74] sm:$0xf]  ;;  %v2260_v28 = vld [vmem:[%s3328_s0 + $0x15c] sm:$0xf] }
  0x2c   :  { %v2263_v27 = vld [vmem:[%s3328_s0 + $0x170] sm:$0xf0] }
  0x2e   :  { %935 = vmatpush.bf16.msrb.mxu2 %v2293_v31  ;;  %886 = vmatpush.bf16.msrb.mxu1 %v2285_v33  ;;  %v2317_v31 = vld [vmem:[%s3327_s1 + $0x160] sm:$0xff]  ;;  %v1765_v33 = vld [vmem:[%s3328_s0 + $0x8c] sm:$0xf0] }
  0x2f   :  { %984 = vmatpush.bf16.msrb.mxu3 %v2301_v34  ;;  %1033 = vmatpush.bf16.msrb.mxu0 %v2309_v42  ;;  %v1771_v34 = vld [vmem:[%s3328_s0 + $0x78] sm:$0xf]  ;;  %v1768_v38 = vor.u32 %v2231_v32, %v1765_v33  ;;  %v2236_v42 = vld [vmem:[%s3328_s0 + $0x98] sm:$0xf0] }
  0x31   :  { %857 = vmatmul.bf16.gmra.mxu1 %v1792_v45  ;;  %867 = vmatmul.bf16.gmra.mxu2 %v1848_v46  ;;  %v2316_v45 = vld [vmem:[%s3327_s1 + $0x158] sm:$0xff]  ;;  %v2238_v46 = vld [vmem:[%s3328_s0 + $0xac] sm:$0xf] }
  0x32   :  { %936 = vmatpush.bf16.msrb.mxu2 %v2292_v39  ;;  %887 = vmatpush.bf16.msrb.mxu1 %v2284_v43  ;;  %v1772_v39 = vor.u32 %v2235_v35, %v1771_v34  ;;  %v1780_v43 = vor.u32 %v2236_v42, %v1779_v41  ;;  %v1891_v34 = vld [vmem:[%s3328_s0 + $0x160] sm:$0xf]  ;;  %v2264_v35 = vld [vmem:[%s3328_s0 + $0x178] sm:$0xf0]  ;;  %v2266_v41 = vld [vmem:[%s3328_s0 + $0x18c] sm:$0xf] }
  0x33   :  { %985 = vmatpush.bf16.msrb.mxu3 %v2300_v44  ;;  %1034 = vmatpush.bf16.msrb.mxu0 %v2308_v51  ;;  %v2324_v44 = vld [vmem:[%s3327_s1 + $0x198] sm:$0xff]  ;;  %v1801_v51 = vld [vmem:[%s3328_s0 + $0xcc] sm:$0xf0]  ;;  %v1892_v36 = vor.u32 %v2264_v35, %v1891_v34 }
  0x34   :  { %877 = vmatmul.bf16.gmra.mxu3 %v1904_v47  ;;  %847 = vmatmul.bf16.gmra.mxu0 %v1736_v54  ;;  %v1793_v47 = vld [vmem:[%s3328_s0 + $0xc4] sm:$0xf0] }
  0x36   :  { %937 = vmatpush.bf16.msrb.mxu2 %v2291_v50  ;;  %888 = vmatpush.bf16.msrb.mxu1 %v2283_v52  ;;  %v2239_v50 = vld [vmem:[%s3328_s0 + $0xb4] sm:$0xf]  ;;  %v1796_v52 = vor.u32 %v2238_v46, %v1793_v47  ;;  %v1913_v47 = vld [vmem:[%s3328_s0 + $0x1ac] sm:$0xf0] }
  0x37   :  { %986 = vmatpush.bf16.msrb.mxu3 %v2299_v53  ;;  %1035 = vmatpush.bf16.msrb.mxu0 %v2307_v56  ;;  %v1800_v53 = vor.u32 %v2242_v49, %v1799_v48  ;;  %v1804_v54 = vor.u32 %v2239_v50, %v1801_v51  ;;  %v2243_v56 = vld [vmem:[%s3328_s0 + $0xd0] sm:$0xf0] }
  0x38   :  { %v2267_v46 = vld [vmem:[%s3328_s0 + $0x194] sm:$0xf] }
  0x3a   :  { %938 = vmatpush.bf16.msrb.mxu2 %v2290_v55  ;;  %889 = vmatpush.bf16.msrb.mxu1 %v2282_v57  ;;  %v1807_v55 = vld [vmem:[%s3328_s0 + $0xb8] sm:$0xf] }
  0x3b   :  { %987 = vmatpush.bf16.msrb.mxu3 %v2298_v58  ;;  %1036 = vmatpush.bf16.msrb.mxu0 %v2306_v60  ;;  %v1808_v57 = vor.u32 %v2243_v56, %v1807_v55  ;;  %v2323_v58 = vld [vmem:[%s3327_s1 + $0x190] sm:$0xff]  ;;  %v2245_v60 = vld [vmem:[%s3328_s0 + $0xe4] sm:$0xf] }
  0x3c   :  { %v2271_v55 = vld [vmem:[%s3328_s0 + $0x1b0] sm:$0xf0] }
  0x3e   :  { %939 = vmatpush.bf16.msrb.mxu2 %v2289_v59  ;;  %890 = vmatpush.bf16.msrb.mxu1 %v2281_v61  ;;  %v2315_v59 = vld [vmem:[%s3327_s1 + $0x150] sm:$0xff]  ;;  %v1821_v61 = vld [vmem:[%s3328_s0 + $0xfc] sm:$0xf0] }
  0x3f   :  { %988 = vmatpush.bf16.msrb.mxu3 %v2297_v62  ;;  %1037 = vmatpush.bf16.msrb.mxu0 %v2305_v7  ;;  %v1827_v62 = vld [vmem:[%s3328_s0 + $0xe8] sm:$0xf]  ;;  %v1824_v2 = vor.u32 %v2245_v60, %v1821_v61  ;;  %v1836_v7 = vor.u32 %v2250_v6, %v1835_v5  ;;  %v2219_v61 = vld [vmem:[%s3328_s0 + $0x14] sm:$0xf] }
  0x40   :  { %v1828_v3 = vor.u32 %v2249_v63, %v1827_v62  ;;  %v1725_v63 = vld [vmem:[%s3328_s0 + $0x2c] sm:$0xf0] }
  0x41   :  { %891 = vmatmul.bf16.vlgmr.msrb.gmra.mxu1 %v1712_v8  ;;  %940 = vmatmul.bf16.vlgmr.msrb.gmra.mxu2 %v1716_v9  ;;  %v2322_v8 = vld [vmem:[%s3327_s1 + $0x188] sm:$0xff] }
  0x42   :  { %1128 = vmatpush.bf16.msra.mxu2 %v2328_v0  ;;  %1079 = vmatpush.bf16.msra.mxu1 %v2320_v1  ;;  %v2246_v0 = vld [vmem:[%s3328_s0 + $0xec] sm:$0xf]  ;;  %v1829_v1 = vld [vmem:[%s3328_s0 + $0x104] sm:$0xf0] }
  0x43   :  { %v1832_v4 = vor.u32 %v2246_v0, %v1829_v1  ;;  %v2314_v9 = vld [vmem:[%s3327_s1 + $0x148] sm:$0xff]  ;;  %v1731_v0 = vld [vmem:[%s3328_s0 + $0x18] sm:$0xf]  ;;  %v2223_v1 = vld [vmem:[%s3328_s0 + $0x30] sm:$0xf0] }
  0x44   :  { %989 = vmatmul.bf16.vlgmr.msrb.gmra.mxu3 %v1720_v10  ;;  %1038 = vmatmul.bf16.vlgmr.msrb.gmra.mxu0 %v1724_v15  ;;  %v2252_v10 = vld [vmem:[%s3328_s0 + $0x11c] sm:$0xf]  ;;  %v1857_v15 = vld [vmem:[%s3328_s0 + $0x13c] sm:$0xf0]  ;;  %v1732_v5 = vor.u32 %v2223_v1, %v1731_v0 }
  0x46   :  { %1129 = vmatpush.bf16.msra.mxu2 %v2327_v13  ;;  %1080 = vmatpush.bf16.msra.mxu1 %v2319_v14  ;;  %v2256_v13 = vld [vmem:[%s3328_s0 + $0x138] sm:$0xf0]  ;;  %v2253_v14 = vld [vmem:[%s3328_s0 + $0x124] sm:$0xf] }
  0x47   :  { %v1860_v18 = vor.u32 %v2253_v14, %v1857_v15  ;;  %v2226_v15 = vld [vmem:[%s3328_s0 + $0x4c] sm:$0xf] }
  0x4a   :  { %1130 = vmatpush.bf16.msra.mxu2 %v2326_v16  ;;  %1081 = vmatpush.bf16.msra.mxu1 %v2318_v17  ;;  %v1852_v16 = vor.u32 %v2252_v10, %v1849_v11  ;;  %v1856_v17 = vor.u32 %v2256_v13, %v1855_v12 }
  0x4e   :  { %1131 = vmatpush.bf16.msra.mxu2 %v2325_v30  ;;  %1082 = vmatpush.bf16.msra.mxu1 %v2317_v31 }
  0x51   :  { %896 = vmatmul.bf16.gmra.mxu1 %v1740_v24  ;;  %945 = vmatmul.bf16.gmra.mxu2 %v1744_v25  ;;  %v2259_v24 = vld [vmem:[%s3328_s0 + $0x154] sm:$0xf]  ;;  %v1877_v25 = vld [vmem:[%s3328_s0 + $0x16c] sm:$0xf0] }
  0x52   :  { %1132 = vmatpush.bf16.msra.mxu2 %v2324_v44  ;;  %1083 = vmatpush.bf16.msra.mxu1 %v2316_v45  ;;  %v1880_v30 = vor.u32 %v2259_v24, %v1877_v25  ;;  %v1911_v44 = vld [vmem:[%s3328_s0 + $0x190] sm:$0xf]  ;;  %v2270_v45 = vld [vmem:[%s3328_s0 + $0x1a8] sm:$0xf0] }
  0x53   :  { %v1912_v51 = vor.u32 %v2270_v45, %v1911_v44 }
  0x54   :  { %994 = vmatmul.bf16.gmra.mxu3 %v1748_v26  ;;  %1043 = vmatmul.bf16.gmra.mxu0 %v1752_v29  ;;  %v1883_v26 = vld [vmem:[%s3328_s0 + $0x158] sm:$0xf] }
  0x55   :  { %v1885_v29 = vld [vmem:[%s3328_s0 + $0x174] sm:$0xf0]  ;;  %v1884_v31 = vor.u32 %v2263_v27, %v1883_v26 }
  0x56   :  { %1133 = vmatpush.bf16.msra.mxu2 %v2323_v58  ;;  %1084 = vmatpush.bf16.msra.mxu1 %v2315_v59  ;;  %v1888_v33 = vor.u32 %v2260_v28, %v1885_v29 }
  0x5a   :  { %1134 = vmatpush.bf16.msra.mxu2 %v2322_v8  ;;  %1085 = vmatpush.bf16.msra.mxu1 %v2314_v9 }
  0x5e   :  { %1135 = vmatpush.bf16.msra.mxu2 %v2321_v22  ;;  %1086 = vmatpush.bf16.msra.mxu1 %v2313_v23 }
  0x61   :  { %901 = vmatmul.bf16.gmra.mxu1 %v1768_v38  ;;  %950 = vmatmul.bf16.gmra.mxu2 %v1772_v39 }
  0x64   :  { %999 = vmatmul.bf16.gmra.mxu3 %v1776_v40  ;;  %1048 = vmatmul.bf16.gmra.mxu0 %v1780_v43  ;;  %v1905_v43 = vld [vmem:[%s3328_s0 + $0x1a4] sm:$0xf0] }
  0x65   :  { %v1908_v50 = vor.u32 %v2266_v41, %v1905_v43  ;;  %v1787_v41 = vld [vmem:[%s3328_s0 + $0x88] sm:$0xf] }
  0x71   :  { %906 = vmatmul.bf16.gmra.mxu1 %v1796_v52  ;;  %955 = vmatmul.bf16.gmra.mxu2 %v1800_v53  ;;  %v1916_v53 = vor.u32 %v2267_v46, %v1913_v47 }
  0x74   :  { %1004 = vmatmul.bf16.gmra.mxu3 %v1804_v54  ;;  %1053 = vmatmul.bf16.gmra.mxu0 %v1808_v57  ;;  %v1919_v54 = vld [vmem:[%s3328_s0 + $0x198] sm:$0xf] }
  0x75   :  { %v1920_v56 = vor.u32 %v2271_v55, %v1919_v54 }
  0x81   :  { %911 = vmatmul.bf16.gmra.mxu1 %v1824_v2  ;;  %960 = vmatmul.bf16.gmra.mxu2 %v1828_v3 }
  0x84   :  { %1009 = vmatmul.bf16.gmra.mxu3 %v1832_v4  ;;  %1058 = vmatmul.bf16.gmra.mxu0 %v1836_v7  ;;  %v1728_v4 = vor.u32 %v2219_v61, %v1725_v63 }
  0x91   :  { %916 = vmatmul.bf16.gmra.mxu1 %v1852_v16  ;;  %965 = vmatmul.bf16.gmra.mxu2 %v1856_v17  ;;  %v1753_v17 = vld [vmem:[%s3328_s0 + $0x64] sm:$0xf0] }
  0x92   :  { %v1756_v24 = vor.u32 %v2226_v15, %v1753_v17 }
  0x94   :  { %1014 = vmatmul.bf16.gmra.mxu3 %v1860_v18  ;;  %1063 = vmatmul.bf16.gmra.mxu0 %v1864_v21  ;;  %v1759_v18 = vld [vmem:[%s3328_s0 + $0x50] sm:$0xf] }
  0x95   :  { %v1760_v25 = vor.u32 %v2230_v19, %v1759_v18  ;;  %v2247_v18 = vld [vmem:[%s3328_s0 + $0xf4] sm:$0xf]  ;;  %v1837_v19 = vld [vmem:[%s3328_s0 + $0x10c] sm:$0xf0] }
  0x9e   :  { %v2802_v32 = vpop.f32.mrf.mxu1 }
  0xa1   :  { %921 = vmatmul.bf16.gmra.mxu1 %v1880_v30  ;;  %970 = vmatmul.bf16.gmra.mxu2 %v1884_v31  ;;  %v843_v37 = vpop.f32.mrf.mxu0 }
  0xa4   :  { %1019 = vmatmul.bf16.gmra.mxu3 %v1888_v33  ;;  %v2810_v38 = vpop.f32.mrf.mxu2  ;;  %1068 = vmatmul.bf16.gmra.mxu0 %v1892_v36  ;;  %v2233_v36 = vld [vmem:[%s3328_s0 + $0x84] sm:$0xf] }
  0xa6   :  { %v2814_v40 = vpop.f32.mrf.mxu1 }
  0xa7   :  { %v2812_v39 = vpop.f32.mrf.mxu3 }
  0xa9   :  { %v845_v42 = vpop.f32.mrf.mxu0 }
  0xac   :  { %v2834_v48 = vpop.f32.mrf.mxu2 }
  0xae   :  { %v2838_v52 = vpop.f32.mrf.mxu1 }
  0xaf   :  { %v2836_v49 = vpop.f32.mrf.mxu3 }
  0xb1   :  { %926 = vmatmul.bf16.gmra.mxu1 %v1908_v50  ;;  %975 = vmatmul.bf16.gmra.mxu2 %v1912_v51  ;;  %v848_v57 = vpop.f32.mrf.mxu0 }
  0xb4   :  { %1024 = vmatmul.bf16.gmra.mxu3 %v1916_v53  ;;  %v2846_v58 = vpop.f32.mrf.mxu2  ;;  %1073 = vmatmul.bf16.gmra.mxu0 %v1920_v56 }
  0xb6   :  { %v2850_v60 = vpop.f32.mrf.mxu1 }
  0xb7   :  { %v2848_v59 = vpop.f32.mrf.mxu3 }
  0xb9   :  { %v850_v62 = vpop.f32.mrf.mxu0 }
  0xbc   :  { %v2864_v2 = vpop.f32.mrf.mxu2 }
  0xbe   :  { %v892_v6 = vpop.f32.mrf.mxu1 }
  0xbf   :  { %v2866_v3 = vpop.f32.mrf.mxu3  ;;  %v893_v7 = vadd.f32 %v892_v6, %v843_v37  ;;  %v1781_v37 = vld [vmem:[%s3328_s0 + $0x9c] sm:$0xf0]  ;;  %v2244_v6 = vld [vmem:[%s3328_s0 + $0xd8] sm:$0xf0] }
  0xc0   :  { %v1784_v50 = vor.u32 %v2233_v36, %v1781_v37 }
  0xc1   :  { %1087 = vmatmul.bf16.vlgmr.msra.gmra.mxu1 %v1728_v4  ;;  %1136 = vmatmul.bf16.vlgmr.msra.gmra.mxu2 %v1732_v5  ;;  %v1039_v8 = vpop.f32.mrf.mxu0  ;;  %v2240_v4 = vld [vmem:[%s3328_s0 + $0xbc] sm:$0xf]  ;;  %v1815_v5 = vld [vmem:[%s3328_s0 + $0xc0] sm:$0xf] }
  0xc4   :  { %v941_v9 = vpop.f32.mrf.mxu2 }
  0xc5   :  { %v942_v10 = vadd.f32 %v941_v9, %v893_v7  ;;  %v1816_v9 = vor.u32 %v2244_v6, %v1815_v5 }
  0xc6   :  { %v894_v12 = vpop.f32.mrf.mxu1 }
  0xc7   :  { %v990_v11 = vpop.f32.mrf.mxu3  ;;  %v895_v20 = vadd.f32 %v894_v12, %v845_v42  ;;  %v2237_v42 = vld [vmem:[%s3328_s0 + $0xa0] sm:$0xf0] }
  0xc8   :  { %v991_v13 = vadd.f32 %v990_v11, %v942_v10  ;;  %v1788_v51 = vor.u32 %v2237_v42, %v1787_v41 }
  0xc9   :  { %v2873_v16 = vpop.f32.mrf.mxu0 }
  0xca   :  { %v2868_v14 = vadd.f32 %v1039_v8, %v991_v13 }
  0xcc   :  { %v943_v21 = vpop.f32.mrf.mxu2 }
  0xcd   :  { %v2884_v22 = vadd.f32 %v943_v21, %v895_v20  ;;  %v2251_v20 = vld [vmem:[%s3328_s0 + $0x110] sm:$0xf0] }
  0xce   :  { %v897_v26 = vpop.f32.mrf.mxu1 }
  0xcf   :  { %v2886_v23 = vpop.f32.mrf.mxu3  ;;  %v898_v27 = vadd.f32 %v897_v26, %v848_v57 }
  0xd1   :  { %1092 = vmatmul.bf16.gmra.mxu1 %v1756_v24  ;;  %1141 = vmatmul.bf16.gmra.mxu2 %v1760_v25  ;;  %v1044_v28 = vpop.f32.mrf.mxu0 }
  0xd4   :  { %v946_v29 = vpop.f32.mrf.mxu2 }
  0xd5   :  { %v947_v30 = vadd.f32 %v946_v29, %v898_v27 }
  0xd6   :  { %v899_v33 = vpop.f32.mrf.mxu1 }
  0xd7   :  { %v995_v31 = vpop.f32.mrf.mxu3  ;;  %v900_v43 = vadd.f32 %v899_v33, %v850_v62  ;;  %v1865_v33 = vld [vmem:[%s3328_s0 + $0x144] sm:$0xf0] }
  0xd8   :  { %v996_v34 = vadd.f32 %v995_v31, %v947_v30  ;;  %v2254_v31 = vld [vmem:[%s3328_s0 + $0x12c] sm:$0xf] }
  0xd9   :  { %v2902_v45 = vpop.f32.mrf.mxu0  ;;  %v1868_v42 = vor.u32 %v2254_v31, %v1865_v33 }
  0xda   :  { %v2888_v35 = vadd.f32 %v1044_v28, %v996_v34  ;;  %v1871_v34 = vld [vmem:[%s3328_s0 + $0x130] sm:$0xf] }
  0xdc   :  { %v948_v44 = vpop.f32.mrf.mxu2 }
  0xdd   :  { %v2904_v46 = vadd.f32 %v948_v44, %v900_v43 }
  0xde   :  { %v902_v53 = vpop.f32.mrf.mxu1 }
  0xdf   :  { %v2906_v47 = vpop.f32.mrf.mxu3  ;;  %v903_v54 = vadd.f32 %v902_v53, %v2802_v32  ;;  %v1809_v32 = vld [vmem:[%s3328_s0 + $0xd4] sm:$0xf0] }
  0xe0   :  { %v1812_v8 = vor.u32 %v2240_v4, %v1809_v32 }
  0xe1   :  { %1097 = vmatmul.bf16.gmra.mxu1 %v1784_v50  ;;  %1146 = vmatmul.bf16.gmra.mxu2 %v1788_v51  ;;  %v1049_v63 = vpop.f32.mrf.mxu0 }
  0xe4   :  { %v951_v55 = vpop.f32.mrf.mxu2 }
  0xe5   :  { %v952_v56 = vadd.f32 %v951_v55, %v903_v54  ;;  %v2261_v55 = vld [vmem:[%s3328_s0 + $0x164] sm:$0xf] }
  0xe6   :  { %v904_v61 = vpop.f32.mrf.mxu1 }
  0xe7   :  { %v1000_v57 = vpop.f32.mrf.mxu3  ;;  %v905_v62 = vadd.f32 %v904_v61, %v2814_v40 }
  0xe8   :  { %v1001_v0 = vadd.f32 %v1000_v57, %v952_v56  ;;  %v1899_v56 = vld [vmem:[%s3328_s0 + $0x168] sm:$0xf] }
  0xea   :  { %v2910_v1 = vadd.f32 %v1049_v63, %v1001_v0 }
  0xec   :  { %v953_v40 = vpop.f32.mrf.mxu2 }
  0xed   :  { %v2924_v7 = vadd.f32 %v953_v40, %v905_v62 }
  0xee   :  { %v907_v10 = vpop.f32.mrf.mxu1 }
  0xef   :  { %v908_v11 = vadd.f32 %v907_v10, %v2838_v52  ;;  %v1843_v52 = vld [vmem:[%s3328_s0 + $0xf8] sm:$0xf] }
  0xf0   :  { %v1844_v25 = vor.u32 %v2251_v20, %v1843_v52 }
  0xf1   :  { %1102 = vmatmul.bf16.gmra.mxu1 %v1812_v8  ;;  %1151 = vmatmul.bf16.gmra.mxu2 %v1816_v9  ;;  %v2268_v8 = vld [vmem:[%s3328_s0 + $0x19c] sm:$0xf]  ;;  %v1927_v9 = vld [vmem:[%s3328_s0 + $0x1a0] sm:$0xf] }
  0xf4   :  { %v956_v12 = vpop.f32.mrf.mxu2 }
  0xf5   :  { %v2927_v13 = vadd.f32 %v956_v12, %v908_v11 }
  0xf6   :  { %v909_v15 = vpop.f32.mrf.mxu1 }
  0xf7   :  { %v910_v17 = vadd.f32 %v909_v15, %v2850_v60  ;;  %v1840_v60 = vor.u32 %v2247_v18, %v1837_v19 }
  0xfc   :  { %v958_v21 = vpop.f32.mrf.mxu2 }
  0xfd   :  { %v2942_v24 = vadd.f32 %v958_v21, %v910_v17 }
  0xfe   :  { %v912_v26 = vpop.f32.mrf.mxu1 }
  0xff   :  { %v913_v27 = vadd.f32 %v912_v26, %v2810_v38  ;;  %v2258_v38 = vld [vmem:[%s3328_s0 + $0x148] sm:$0xf0] }
 0x100   :  { %v1872_v43 = vor.u32 %v2258_v38, %v1871_v34 }
 0x101   :  { %1107 = vmatmul.bf16.gmra.mxu1 %v1840_v60  ;;  %1156 = vmatmul.bf16.gmra.mxu2 %v1844_v25 }
 0x104   :  { %v961_v28 = vpop.f32.mrf.mxu2 }
 0x105   :  { %v2945_v29 = vadd.f32 %v961_v28, %v913_v27  ;;  %v993_v28 = vadd.f32 %v2886_v23, %v2884_v22 }
 0x106   :  { %v914_v30 = vpop.f32.mrf.mxu1 }
 0x107   :  { %v915_v36 = vadd.f32 %v914_v30, %v2834_v48  ;;  %v1893_v48 = vld [vmem:[%s3328_s0 + $0x17c] sm:$0xf0]  ;;  %v1042_v31 = vadd.f32 %v2873_v16, %v993_v28 }
 0x108   :  { %v1896_v62 = vor.u32 %v2261_v55, %v1893_v48 }
 0x10c   :  { %v963_v37 = vpop.f32.mrf.mxu2 }
 0x10d   :  { %v2960_v41 = vadd.f32 %v963_v37, %v915_v36  ;;  %v1002_v36 = vpop.f32.mrf.mxu3 }
 0x10e   :  { %v917_v44 = vpop.f32.mrf.mxu1 }
 0x10f   :  { %v918_v50 = vadd.f32 %v917_v44, %v2846_v58  ;;  %v2265_v58 = vld [vmem:[%s3328_s0 + $0x180] sm:$0xf0] }
 0x110   :  { %v1900_v0 = vor.u32 %v2265_v58, %v1899_v56 }
 0x111   :  { %1112 = vmatmul.bf16.gmra.mxu1 %v1868_v42  ;;  %1161 = vmatmul.bf16.gmra.mxu2 %v1872_v43  ;;  %v1051_v43 = vpop.f32.mrf.mxu0 }
 0x114   :  { %v966_v51 = vpop.f32.mrf.mxu2 }
 0x115   :  { %v2963_v53 = vadd.f32 %v966_v51, %v918_v50  ;;  %v1005_v50 = vpop.f32.mrf.mxu3 }
 0x116   :  { %v919_v54 = vpop.f32.mrf.mxu1 }
 0x117   :  { %v920_v57 = vadd.f32 %v919_v54, %v2864_v2  ;;  %v1921_v2 = vld [vmem:[%s3328_s0 + $0x1b4] sm:$0xf0] }
 0x118   :  { %v1924_v15 = vor.u32 %v2268_v8, %v1921_v2  ;;  %v2336_v54 = vld [vmem:[%s3329_s4 + $0x38] sm:$0xff] }
 0x119   :  { %1381 = vmatpush.bf16.msra.mxu3 %v2336_v54  ;;  %v1054_v55 = vpop.f32.mrf.mxu0 }
 0x11c   :  { %v968_v61 = vpop.f32.mrf.mxu2 }
 0x11d   :  { %v2978_v63 = vadd.f32 %v968_v61, %v920_v57 }
 0x11e   :  { %v922_v4 = vpop.f32.mrf.mxu1 }
 0x11f   :  { %v923_v32 = vadd.f32 %v922_v4, %v2812_v39  ;;  %v2272_v39 = vld [vmem:[%s3328_s0 + $0x1b8] sm:$0xf0] }
 0x120   :  { %v1928_v17 = vor.u32 %v2272_v39, %v1927_v9 }
 0x121   :  { %1117 = vmatmul.bf16.gmra.mxu1 %v1896_v62  ;;  %1166 = vmatmul.bf16.gmra.mxu2 %v1900_v0  ;;  %v1056_v57 = vpop.f32.mrf.mxu0  ;;  %v2335_v62 = vld [vmem:[%s3329_s4 + $0x30] sm:$0xff] }
 0x122   :  { %1382 = vmatpush.bf16.msra.mxu3 %v2335_v62 }
 0x124   :  { %v971_v5 = vpop.f32.mrf.mxu2 }
 0x125   :  { %v2981_v6 = vadd.f32 %v971_v5, %v923_v32 }
 0x126   :  { %v924_v40 = vpop.f32.mrf.mxu1 }
 0x127   :  { %v925_v10 = vadd.f32 %v924_v40, %v2836_v49 }
 0x129   :  { %v1059_v5 = vpop.f32.mrf.mxu0 }
 0x12c   :  { %v973_v11 = vpop.f32.mrf.mxu2 }
 0x12d   :  { %v2996_v12 = vadd.f32 %v973_v11, %v925_v10 }
 0x12e   :  { %v927_v18 = vpop.f32.mrf.mxu1 }
 0x12f   :  { %v928_v19 = vadd.f32 %v927_v18, %v2848_v59 }
 0x131   :  { %1122 = vmatmul.bf16.gmra.mxu1 %v1924_v15  ;;  %1171 = vmatmul.bf16.gmra.mxu2 %v1928_v17  ;;  %v1061_v9 = vpop.f32.mrf.mxu0 }
 0x134   :  { %v976_v52 = vpop.f32.mrf.mxu2 }
 0x135   :  { %v2999_v20 = vadd.f32 %v976_v52, %v928_v19  ;;  %v2333_v52 = vld [vmem:[%s3329_s4 + $0x20] sm:$0xff] }
 0x136   :  { %v929_v21 = vpop.f32.mrf.mxu1 }
 0x137   :  { %v930_v60 = vadd.f32 %v929_v21, %v2866_v3 }
 0x139   :  { %v1064_v15 = vpop.f32.mrf.mxu0 }
 0x13c   :  { %v978_v25 = vpop.f32.mrf.mxu2 }
 0x13d   :  { %v3002_v26 = vadd.f32 %v978_v25, %v930_v60 }
 0x13e   :  { %v1088_v49 = vpop.f32.mrf.mxu1 }
 0x13f   :  { %v1089_v27 = vadd.f32 %v1088_v49, %v2868_v14  ;;  %v998_v14 = vadd.f32 %v2906_v47, %v2904_v46  ;;  %v1007_v47 = vpop.f32.mrf.mxu3 }
 0x141   :  { %v1047_v22 = vadd.f32 %v2902_v45, %v998_v14  ;;  %v1066_v60 = vpop.f32.mrf.mxu0  ;;  %v1008_v14 = vadd.f32 %v1007_v47, %v2942_v24 }
 0x144   :  { %v1137_v30 = vpop.f32.mrf.mxu2 }
 0x145   :  { %v3008_v33 = vadd.f32 %v1137_v30, %v1089_v27 }
 0x146   :  { %v1090_v59 = vpop.f32.mrf.mxu1 }
 0x147   :  { %v1091_v34 = vadd.f32 %v1090_v59, %v1042_v31  ;;  %v1010_v0 = vpop.f32.mrf.mxu3  ;;  %v2332_v31 = vld [vmem:[%s3329_s4 + $0x18] sm:$0xff]  ;;  %v1003_v59 = vadd.f32 %v1002_v36, %v2924_v7  ;;  %v1198_v7 = vmul.f32 %v3008_v33, %v3008_v33 }
 0x149   :  { %v1069_v30 = vpop.f32.mrf.mxu0 }
 0x14c   :  { %v1139_v38 = vpop.f32.mrf.mxu2 }
 0x14d   :  { %v3010_v37 = vadd.f32 %v1139_v38, %v1091_v34 }
 0x14e   :  { %v1093_v3 = vpop.f32.mrf.mxu1 }
 0x14f   :  { %v1094_v42 = vadd.f32 %v1093_v3, %v2888_v35  ;;  %v1012_v8 = vpop.f32.mrf.mxu3  ;;  %v1006_v3 = vadd.f32 %v1005_v50, %v2927_v13  ;;  %v1057_v13 = vadd.f32 %v1056_v57, %v1008_v14  ;;  %v1177_v24 = vadd.f32 %v3010_v37, %v3008_v33 }
 0x150   :  { %v1013_v50 = vadd.f32 %v1012_v8, %v2960_v41 }
 0x151   :  { %v1071_v54 = vpop.f32.mrf.mxu0 }
 0x152   :  { %v1062_v8 = vadd.f32 %v1061_v9, %v1013_v50 }
 0x154   :  { %v1142_v44 = vpop.f32.mrf.mxu2 }
 0x155   :  { %v3016_v23 = vadd.f32 %v1142_v44, %v1094_v42  ;;  %v1052_v44 = vadd.f32 %v1051_v43, %v1003_v59 }
 0x156   :  { %v1095_v16 = vpop.f32.mrf.mxu1 }
 0x157   :  { %v1096_v51 = vadd.f32 %v1095_v16, %v1047_v22  ;;  %v1015_v11 = vpop.f32.mrf.mxu3  ;;  %v1199_v22 = vmul.f32 %v3010_v37, %v3010_v37  ;;  %v1011_v16 = vadd.f32 %v1010_v0, %v2945_v29  ;;  %v1200_v36 = vmul.f32 %v3016_v23, %v3016_v23 }
 0x159   :  { %v1214_v43 = vadd.f32 %v1199_v22, %v1198_v7  ;;  %v1060_v47 = vadd.f32 %v1059_v5, %v1011_v16  ;;  %v1074_v16 = vpop.f32.mrf.mxu0 }
 0x15b   :  { %v1215_v62 = vadd.f32 %v1214_v43, %v1200_v36 }
 0x15c   :  { %v1144_v48 = vpop.f32.mrf.mxu2 }
 0x15d   :  { %v3021_v35 = vadd.f32 %v1144_v48, %v1096_v51  ;;  %v1055_v51 = vadd.f32 %v1054_v55, %v1006_v3 }
 0x15e   :  { %v1098_v56 = vpop.f32.mrf.mxu1 }
 0x15f   :  { %v1099_v46 = vadd.f32 %v1098_v56, %v2910_v1  ;;  %v2334_v1 = vld [vmem:[%s3329_s4 + $0x28] sm:$0xff]  ;;  %v1017_v19 = vpop.f32.mrf.mxu3  ;;  %v1201_v56 = vmul.f32 %v3021_v35, %v3021_v35 }
 0x160   :  { %1383 = vmatpush.bf16.msra.mxu3 %v2334_v1  ;;  %v1016_v1 = vadd.f32 %v1015_v11, %v2963_v53  ;;  %v1018_v3 = vadd.f32 %v1017_v19, %v2978_v63 }
 0x162   :  { %v1065_v11 = vadd.f32 %v1064_v15, %v1016_v1 }
 0x164   :  { %v1147_v58 = vpop.f32.mrf.mxu2  ;;  %1384 = vmatpush.bf16.msra.mxu3 %v2333_v52 }
 0x165   :  { %v3024_v45 = vadd.f32 %v1147_v58, %v1099_v46  ;;  %v1178_v58 = vadd.f32 %v1177_v24, %v3016_v23 }
 0x166   :  { %v1100_v61 = vpop.f32.mrf.mxu1 }
 0x167   :  { %v1020_v49 = vpop.f32.mrf.mxu3  ;;  %v1101_v48 = vadd.f32 %v1100_v61, %v1052_v44  ;;  %v1202_v57 = vmul.f32 %v3024_v45, %v3024_v45 }
 0x168   :  { %1385 = vmatpush.bf16.msra.mxu3 %v2332_v31  ;;  %v1216_v31 = vadd.f32 %v1215_v62, %v1201_v56  ;;  %v1021_v44 = vadd.f32 %v1020_v49, %v2981_v6 }
 0x16a   :  { %v1217_v14 = vadd.f32 %v1216_v31, %v1202_v57 }
 0x16c   :  { %v1149_v4 = vpop.f32.mrf.mxu2 }
 0x16d   :  { %v3061_v29 = vadd.f32 %v1149_v4, %v1101_v48  ;;  %v1179_v4 = vadd.f32 %v1178_v58, %v3021_v35  ;;  %v1070_v48 = vadd.f32 %v1069_v30, %v1021_v44 }
 0x16e   :  { %v1103_v32 = vpop.f32.mrf.mxu1 }
 0x16f   :  { %v1022_v38 = vpop.f32.mrf.mxu3  ;;  %v1104_v55 = vadd.f32 %v1103_v32, %v1055_v51  ;;  %v1203_v32 = vmul.f32 %v3061_v29, %v3061_v29  ;;  %v1067_v51 = vadd.f32 %v1066_v60, %v1018_v3 }
 0x170   :  { %v1023_v7 = vadd.f32 %v1022_v38, %v2996_v12 }
 0x174   :  { %v1152_v40 = vpop.f32.mrf.mxu2 }
 0x175   :  { %v3066_v61 = vadd.f32 %v1152_v40, %v1104_v55  ;;  %v1180_v40 = vadd.f32 %v1179_v4, %v3024_v45 }
 0x176   :  { %v1105_v2 = vpop.f32.mrf.mxu1 }
 0x177   :  { %v1106_v41 = vadd.f32 %v1105_v2, %v1057_v13  ;;  %v1025_v52 = vpop.f32.mrf.mxu3  ;;  %v1204_v2 = vmul.f32 %v3066_v61, %v3066_v61  ;;  %v1181_v22 = vadd.f32 %v1180_v40, %v3061_v29 }
 0x178   :  { %v1026_v15 = vadd.f32 %v1025_v52, %v2999_v20 }
 0x17a   :  { %v1075_v43 = vadd.f32 %v1074_v16, %v1026_v15 }
 0x17c   :  { %v1154_v39 = vpop.f32.mrf.mxu2 }
 0x17d   :  { %v3072_v5 = vadd.f32 %v1154_v39, %v1106_v41  ;;  %v1218_v39 = vadd.f32 %v1217_v14, %v1203_v32 }
 0x17e   :  { %v1108_v10 = vpop.f32.mrf.mxu1 }
 0x17f   :  { %v1109_v59 = vadd.f32 %v1108_v10, %v1060_v47  ;;  %v1205_v10 = vmul.f32 %v3072_v5, %v3072_v5  ;;  %v1027_v38 = vpop.f32.mrf.mxu3 }
 0x184   :  { %v1157_v17 = vpop.f32.mrf.mxu2 }
 0x185   :  { %v3078_v9 = vadd.f32 %v1157_v17, %v1109_v59  ;;  %v1182_v17 = vadd.f32 %v1181_v22, %v3066_v61 }
 0x186   :  { %v1110_v18 = vpop.f32.mrf.mxu1 }
 0x187   :  { %v1111_v53 = vadd.f32 %v1110_v18, %v1062_v8  ;;  %v1219_v18 = vadd.f32 %v1218_v39, %v1204_v2  ;;  %v1206_v6 = vmul.f32 %v3078_v9, %v3078_v9  ;;  %v1183_v13 = vadd.f32 %v1182_v17, %v3072_v5  ;;  %v1076_v8 = vpop.f32.mrf.mxu0 }
 0x189   :  { %v1220_v50 = vadd.f32 %v1219_v18, %v1205_v10  ;;  %v1184_v20 = vadd.f32 %v1183_v13, %v3078_v9 }
 0x18b   :  { %v1221_v56 = vadd.f32 %v1220_v50, %v1206_v6 }
 0x18c   :  { %v1159_v21 = vpop.f32.mrf.mxu2 }
 0x18d   :  { %v3084_v63 = vadd.f32 %v1159_v21, %v1111_v53 }
 0x18e   :  { %v1113_v25 = vpop.f32.mrf.mxu1 }
 0x18f   :  { %v1114_v36 = vadd.f32 %v1113_v25, %v1065_v11  ;;  %v1207_v12 = vmul.f32 %v3084_v63, %v3084_v63  ;;  %v1072_v25 = vadd.f32 %v1071_v54, %v1023_v7  ;;  %v1028_v54 = vadd.f32 %v1027_v38, %v3002_v26 }
 0x191   :  { %v1222_v58 = vadd.f32 %v1221_v56, %v1207_v12  ;;  %v1077_v4 = vadd.f32 %v1076_v8, %v1028_v54  ;;  %v2330_v12 = vld [vmem:[%s3329_s4 + $0x8] sm:$0xff] }
 0x194   :  { %v3035_v27 = vpop.f32.mrf.mxu2 }
 0x195   :  { %v3093_v21 = vadd.f32 %v3035_v27, %v1114_v36  ;;  %v1185_v27 = vadd.f32 %v1184_v20, %v3084_v63  ;;  %v2329_v20 = vld [vmem:[%s3329_s4] sm:$0xff] }
 0x196   :  { %v3037_v28 = vpop.f32.mrf.mxu1 }
 0x197   :  { %v1116_v60 = vadd.f32 %v3037_v28, %v1067_v51  ;;  %v1208_v28 = vmul.f32 %v3093_v21, %v3093_v21  ;;  %v1186_v57 = vadd.f32 %v1185_v27, %v3093_v21 }
 0x199   :  { %v1223_v1 = vadd.f32 %v1222_v58, %v1208_v28 }
 0x19c   :  { %v3043_v34 = vpop.f32.mrf.mxu2 }
 0x19d   :  { %v3100_v24 = vadd.f32 %v3043_v34, %v1116_v60 }
 0x19e   :  { %v3046_v42 = vpop.f32.mrf.mxu1 }
 0x19f   :  { %v1119_v30 = vadd.f32 %v3046_v42, %v1070_v48  ;;  %v1209_v34 = vmul.f32 %v3100_v24, %v3100_v24  ;;  %v1187_v52 = vadd.f32 %v1186_v57, %v3100_v24  ;;  %v208_v57 = vld [vmem:[%s3330_s2] sm:$0x1] }
 0x1a1   :  { %v1224_v31 = vadd.f32 %v1223_v1, %v1209_v34  ;;  %v209_v1 = vld [vmem:[%s3331_s3] sm:$0x1] }
 0x1a4   :  { %v1167_v46 = vpop.f32.mrf.mxu2 }
 0x1a5   :  { %v3106_v55 = vadd.f32 %v1167_v46, %v1119_v30 }
 0x1a6   :  { %v1120_v0 = vpop.f32.mrf.mxu1 }
 0x1a7   :  { %v1121_v47 = vadd.f32 %v1120_v0, %v1072_v25  ;;  %v1210_v46 = vmul.f32 %v3106_v55, %v3106_v55  ;;  %v1188_v32 = vadd.f32 %v1187_v52, %v3106_v55 }
 0x1a9   :  { %v1225_v3 = vadd.f32 %v1224_v31, %v1210_v46 }
 0x1ac   :  { %v1169_v19 = vpop.f32.mrf.mxu2 }
 0x1ad   :  { %v3112_v42 = vadd.f32 %v1169_v19, %v1121_v47 }
 0x1ae   :  { %v1123_v49 = vpop.f32.mrf.mxu1 }
 0x1af   :  { %v1124_v41 = vadd.f32 %v1123_v49, %v1075_v43  ;;  %v1211_v59 = vmul.f32 %v3112_v42, %v3112_v42  ;;  %v1189_v40 = vadd.f32 %v1188_v32, %v3112_v42  ;;  %v2331_v49 = vld [vmem:[%s3329_s4 + $0x10] sm:$0xff] }
 0x1b0   :  { %1386 = vmatpush.bf16.msra.mxu3 %v2331_v49 }
 0x1b1   :  { %v1226_v11 = vadd.f32 %v1225_v3, %v1211_v59 }
 0x1b4   :  { %v1172_v62 = vpop.f32.mrf.mxu2  ;;  %1387 = vmatpush.bf16.msra.mxu3 %v2330_v12 }
 0x1b5   :  { %v3117_v0 = vadd.f32 %v1172_v62, %v1124_v41 }
 0x1b6   :  { %v1125_v26 = vpop.f32.mrf.mxu1 }
 0x1b7   :  { %v1212_v14 = vmul.f32 %v3117_v0, %v3117_v0  ;;  %v1126_v2 = vadd.f32 %v1125_v26, %v1077_v4  ;;  %v1190_v44 = vadd.f32 %v1189_v40, %v3117_v0 }
 0x1b8   :  { %1388 = vmatpush.bf16.msra.mxu3 %v2329_v20 }
 0x1b9   :  { %v1227_v16 = vadd.f32 %v1226_v11, %v1212_v14 }
 0x1bc   :  { %v1174_v53 = vpop.f32.mrf.mxu2 }
 0x1bd   :  { %v1175_v22 = vadd.f32 %v1174_v53, %v1126_v2 }
 0x1bf   :  { %v1191_v39 = vadd.f32 %v1190_v44, %v1175_v22  ;;  %v1213_v10 = vmul.f32 %v1175_v22, %v1175_v22 }
 0x1c1   :  { %v1192_v19 = vrot.slane %v1191_v39, 4  ;;  %v1228_v51 = vadd.f32 %v1227_v16, %v1213_v10 }
 0x1c3   :  { %v1193_v7 = vadd.f32 %v1192_v19, %v1191_v39  ;;  %v1229_v17 = vrot.slane %v1228_v51, 4 }
 0x1c5   :  { %v1194_v36 = vrot.slane %v1193_v7, 2  ;;  %v1230_v15 = vadd.f32 %v1229_v17, %v1228_v51 }
 0x1c7   :  { %v1195_v18 = vadd.f32 %v1194_v36, %v1193_v7  ;;  %v1231_v6 = vrot.slane %v1230_v15, 2 }
 0x1c9   :  { %v1196_v48 = vrot.slane %v1195_v18, 1  ;;  %v1232_v13 = vadd.f32 %v1231_v6, %v1230_v15 }
 0x1cb   :  { %v1197_v60 = vadd.f32 %v1196_v48, %v1195_v18  ;;  %v1233_v50 = vrot.slane %v1232_v13, 1 }
 0x1cd   :  { %v1234_v25 = vadd.f32 %v1233_v50, %v1232_v13  ;;  %v1235_v38 = vmul.f32 0.0078125, %v1197_v60 }
 0x1cf   :  { %v1236_v30 = vmul.f32 0.0078125, %v1234_v25  ;;  %v1237_v43 = vmul.f32 %v1235_v38, %v1235_v38 }
 0x1d1   :  { %v1238_v56 = vsub.f32 %v1236_v30, %v1237_v43 }
 0x1d3   :  { %v1239_v27 = vadd.f32 1e-05, %v1238_v56 }
 0x1d5   :  { %2370 = vrsqrt.f32 %v1239_v27  ;;  %vm1246_vm1 = vweird.f32 %v1239_v27 }
 0x1db   :  { %v2371_v28 = vpop.eup %2370 }
 0x1dc   :  { %v1241_v47 = vmul.f32 %v2371_v28, %v1239_v27  ;;  %vm1247_vm0 = vweird.f32 %v2371_v28 }
 0x1dd   :  { %vm1248_vm2 = vmor %vm1246_vm1, %vm1247_vm0 }
 0x1de   :  { %v1242_v54 = vmul.f32 %v2371_v28, %v1241_v47 }
 0x1e0   :  { %v1243_v58 = vmul.f32 0.5, %v1242_v54 }
 0x1e2   :  { %v1244_v62 = vsub.f32 1.5, %v1243_v58 }
 0x1e4   :  { %v1245_v34 = vmul.f32 %v2371_v28, %v1244_v62 }
 0x1e6   :  { %v1249_v41 = vsel %vm1248_vm2, %v2371_v28, %v1245_v34 }
 0x1e7   :  { %v1250_v8 = vmul.f32 %v1249_v41, %v208_v57 }
 0x1e9   :  { %v1251_v52 = vmul.f32 %v1250_v8, %v1235_v38  ;;  %v1254_v46 = vperm.slane %v1250_v8, 0  ;;  %v2344_v8 = vld [vmem:[%s3332_s7 + $0x38] sm:$0xff] }
 0x1ea   :  { %1636 = vmatpush.bf16.msra.mxu0 %v2344_v8 }
 0x1eb   :  { %v1252_v26 = vsub.f32 %v209_v1, %v1251_v52  ;;  %v1271_v4 = vmul.f32 %v1254_v46, %v1175_v22  ;;  %v1256_v31 = vmul.f32 %v1254_v46, %v3008_v33  ;;  %v1257_v32 = vmul.f32 %v1254_v46, %v3010_v37 }
 0x1ec   :  { %v1258_v59 = vmul.f32 %v1254_v46, %v3016_v23  ;;  %v1259_v3 = vmul.f32 %v1254_v46, %v3021_v35  ;;  %v1260_v40 = vmul.f32 %v1254_v46, %v3024_v45  ;;  %v1261_v14 = vmul.f32 %v1254_v46, %v3061_v29 }
 0x1ed   :  { %v1273_v2 = vperm.slane %v1252_v26, 0  ;;  %v1262_v53 = vmul.f32 %v1254_v46, %v3066_v61  ;;  %v1263_v11 = vmul.f32 %v1254_v46, %v3072_v5  ;;  %v1264_v44 = vmul.f32 %v1254_v46, %v3078_v9 }
 0x1ee   :  { %v1265_v22 = vmul.f32 %v1254_v46, %v3084_v63  ;;  %v1266_v33 = vmul.f32 %v1254_v46, %v3093_v21  ;;  %v1267_v37 = vmul.f32 %v1254_v46, %v3100_v24  ;;  %v1268_v23 = vmul.f32 %v1254_v46, %v3106_v55 }
 0x1ef   :  { %v1275_v35 = vadd.f32 %v1273_v2, %v1256_v31  ;;  %v1276_v16 = vadd.f32 %v1273_v2, %v1257_v32  ;;  %v1277_v45 = vadd.f32 %v1273_v2, %v1258_v59  ;;  %v1278_v39 = vadd.f32 %v1273_v2, %v1259_v3  ;;  %v2342_v31 = vld [vmem:[%s3332_s7 + $0x28] sm:$0xff]  ;;  %v2341_v3 = vld [vmem:[%s3332_s7 + $0x20] sm:$0xff] }
 0x1f0   :  { %v1279_v29 = vadd.f32 %v1273_v2, %v1260_v40  ;;  %v1280_v10 = vadd.f32 %v1273_v2, %v1261_v14  ;;  %v1281_v19 = vadd.f32 %v1273_v2, %v1262_v53  ;;  %v1282_v61 = vadd.f32 %v1273_v2, %v1263_v11 }
 0x1f1   :  { %v1291_v51 = vmax.f32 %v1275_v35, 0.0  ;;  %v1292_v5 = vmax.f32 %v1276_v16, 0.0  ;;  %v1293_v7 = vmax.f32 %v1277_v45, 0.0  ;;  %v1294_v9 = vmax.f32 %v1278_v39, 0.0 }
 0x1f2   :  { %v1295_v17 = vmax.f32 %v1279_v29, 0.0  ;;  %v1296_v63 = vmax.f32 %v1280_v10, 0.0  ;;  %v1297_v36 = vmax.f32 %v1281_v19, 0.0  ;;  %v1298_v21 = vmax.f32 %v1282_v61, 0.0 }
 0x1f3   :  { %v1307_v15 = vpack.c.bf16 %v1292_v5, %v1291_v51  ;;  %v1308_v24 = vpack.c.bf16 %v1294_v9, %v1293_v7  ;;  %v1283_v18 = vadd.f32 %v1273_v2, %v1264_v44  ;;  %v1284_v55 = vadd.f32 %v1273_v2, %v1265_v22 }
 0x1f4   :  { %v1309_v6 = vpack.c.bf16 %v1296_v63, %v1295_v17  ;;  %v1310_v49 = vpack.c.bf16 %v1298_v21, %v1297_v36  ;;  %v1285_v48 = vadd.f32 %v1273_v2, %v1266_v33  ;;  %v1286_v13 = vadd.f32 %v1273_v2, %v1267_v37 }
 0x1f5   :  { %1389 = vmatmul.bf16.vlgmr.msra.gmra.mxu3 %v1307_v15  ;;  %v1299_v60 = vmax.f32 %v1283_v18, 0.0  ;;  %v1300_v50 = vmax.f32 %v1284_v55, 0.0  ;;  %v1269_v12 = vmul.f32 %v1254_v46, %v3112_v42  ;;  %v1287_v25 = vadd.f32 %v1273_v2, %v1268_v23 }
 0x1f6   :  { %v1301_v38 = vmax.f32 %v1285_v48, 0.0  ;;  %v1302_v20 = vmax.f32 %v1286_v13, 0.0  ;;  %v1270_v30 = vmul.f32 %v1254_v46, %v3117_v0  ;;  %v1290_v43 = vadd.f32 %v1273_v2, %v1271_v4  ;;  %v2343_v46 = vld [vmem:[%s3332_s7 + $0x30] sm:$0xff] }
 0x1f7   :  { %v1311_v56 = vpack.c.bf16 %v1300_v50, %v1299_v60  ;;  %v1288_v27 = vadd.f32 %v1273_v2, %v1269_v12  ;;  %v1303_v28 = vmax.f32 %v1287_v25, 0.0  ;;  %1637 = vmatpush.bf16.msra.mxu0 %v2343_v46 }
 0x1f8   :  { %v1312_v47 = vpack.c.bf16 %v1302_v20, %v1301_v38  ;;  %v1289_v54 = vadd.f32 %v1273_v2, %v1270_v30  ;;  %v1306_v58 = vmax.f32 %v1290_v43, 0.0  ;;  %v2340_v2 = vld [vmem:[%s3332_s7 + $0x18] sm:$0xff] }
 0x1f9   :  { %v1304_v62 = vmax.f32 %v1288_v27, 0.0 }
 0x1fa   :  { %v1305_v57 = vmax.f32 %v1289_v54, 0.0 }
 0x1fb   :  { %v1313_v34 = vpack.c.bf16 %v1304_v62, %v1303_v28  ;;  %1638 = vmatpush.bf16.msra.mxu0 %v2342_v31 }
 0x1fc   :  { %v1314_v41 = vpack.c.bf16 %v1306_v58, %v1305_v57 }
 0x1ff   :  { %1639 = vmatpush.bf16.msra.mxu0 %v2341_v3 }
 0x203   :  { %1640 = vmatpush.bf16.msra.mxu0 %v2340_v2 }
 0x205   :  { %1394 = vmatmul.bf16.gmra.mxu3 %v1308_v24 }
 0x215   :  { %1399 = vmatmul.bf16.gmra.mxu3 %v1309_v6 }
 0x225   :  { %1404 = vmatmul.bf16.gmra.mxu3 %v1310_v49 }
 0x235   :  { %1409 = vmatmul.bf16.gmra.mxu3 %v1311_v56 }
 0x245   :  { %1414 = vmatmul.bf16.gmra.mxu3 %v1312_v47 }
 0x255   :  { %1419 = vmatmul.bf16.gmra.mxu3 %v1313_v34 }
 0x265   :  { %1424 = vmatmul.bf16.gmra.mxu3 %v1314_v41 }
 0x278   :  { %v3156_v42 = vpop.f32.mrf.mxu3 }
 0x279   :  { %v1451_v22 = vmul.f32 %v3156_v42, %v3156_v42 }
 0x280   :  { %v3158_v0 = vpop.f32.mrf.mxu3 }
 0x281   :  { %v1452_v44 = vmul.f32 %v3158_v0, %v3158_v0  ;;  %v1430_v33 = vadd.f32 %v3158_v0, %v3156_v42 }
 0x283   :  { %v1467_v23 = vadd.f32 %v1452_v44, %v1451_v22 }
 0x288   :  { %v3163_v1 = vpop.f32.mrf.mxu3 }
 0x289   :  { %v1453_v37 = vmul.f32 %v3163_v1, %v3163_v1  ;;  %v1431_v35 = vadd.f32 %v1430_v33, %v3163_v1 }
 0x28b   :  { %v1468_v39 = vadd.f32 %v1467_v23, %v1453_v37 }
 0x290   :  { %v3165_v52 = vpop.f32.mrf.mxu3 }
 0x291   :  { %v1454_v16 = vmul.f32 %v3165_v52, %v3165_v52  ;;  %v1432_v29 = vadd.f32 %v1431_v35, %v3165_v52 }
 0x293   :  { %v1469_v19 = vadd.f32 %v1468_v39, %v1454_v16 }
 0x298   :  { %v3170_v26 = vpop.f32.mrf.mxu3 }
 0x299   :  { %v1455_v10 = vmul.f32 %v3170_v26, %v3170_v26  ;;  %v1433_v61 = vadd.f32 %v1432_v29, %v3170_v26 }
 0x29b   :  { %v1470_v5 = vadd.f32 %v1469_v19, %v1455_v10 }
 0x2a0   :  { %v3172_v4 = vpop.f32.mrf.mxu3 }
 0x2a1   :  { %v1456_v51 = vmul.f32 %v3172_v4, %v3172_v4  ;;  %v1434_v7 = vadd.f32 %v1433_v61, %v3172_v4 }
 0x2a3   :  { %v1471_v17 = vadd.f32 %v1470_v5, %v1456_v51 }
 0x2a8   :  { %v3177_v32 = vpop.f32.mrf.mxu3 }
 0x2a9   :  { %v1457_v9 = vmul.f32 %v3177_v32, %v3177_v32  ;;  %v1435_v63 = vadd.f32 %v1434_v7, %v3177_v32  ;;  %v2339_v7 = vld [vmem:[%s3332_s7 + $0x10] sm:$0xff] }
 0x2aa   :  { %1641 = vmatpush.bf16.msra.mxu0 %v2339_v7 }
 0x2ab   :  { %v1472_v15 = vadd.f32 %v1471_v17, %v1457_v9  ;;  %v2338_v17 = vld [vmem:[%s3332_s7 + $0x8] sm:$0xff] }
 0x2ae   :  { %1642 = vmatpush.bf16.msra.mxu0 %v2338_v17 }
 0x2b0   :  { %v3179_v59 = vpop.f32.mrf.mxu3 }
 0x2b1   :  { %v1458_v36 = vmul.f32 %v3179_v59, %v3179_v59  ;;  %v1436_v24 = vadd.f32 %v1435_v63, %v3179_v59  ;;  %v2337_v63 = vld [vmem:[%s3332_s7] sm:$0xff] }
 0x2b2   :  { %1643 = vmatpush.bf16.msra.mxu0 %v2337_v63 }
 0x2b3   :  { %v1473_v55 = vadd.f32 %v1472_v15, %v1458_v36 }
 0x2b8   :  { %v3184_v40 = vpop.f32.mrf.mxu3 }
 0x2b9   :  { %v1459_v18 = vmul.f32 %v3184_v40, %v3184_v40  ;;  %v1437_v6 = vadd.f32 %v1436_v24, %v3184_v40 }
 0x2bb   :  { %v1474_v48 = vadd.f32 %v1473_v55, %v1459_v18 }
 0x2c0   :  { %v3186_v14 = vpop.f32.mrf.mxu3 }
 0x2c1   :  { %v1460_v49 = vmul.f32 %v3186_v14, %v3186_v14  ;;  %v1438_v13 = vadd.f32 %v1437_v6, %v3186_v14  ;;  %v1331_v6 = vld [vmem:[%s3333_s5] sm:$0x1] }
 0x2c3   :  { %v1475_v50 = vadd.f32 %v1474_v48, %v1460_v49 }
 0x2c8   :  { %v3191_v53 = vpop.f32.mrf.mxu3 }
 0x2c9   :  { %v1461_v60 = vmul.f32 %v3191_v53, %v3191_v53  ;;  %v1439_v12 = vadd.f32 %v1438_v13, %v3191_v53 }
 0x2cb   :  { %v1476_v20 = vadd.f32 %v1475_v50, %v1461_v60  ;;  %v1332_v60 = vld [vmem:[%s3334_s6] sm:$0x1] }
 0x2d0   :  { %v3193_v11 = vpop.f32.mrf.mxu3 }
 0x2d1   :  { %v1462_v25 = vmul.f32 %v3193_v11, %v3193_v11  ;;  %v1440_v30 = vadd.f32 %v1439_v12, %v3193_v11 }
 0x2d3   :  { %v1477_v56 = vadd.f32 %v1476_v20, %v1462_v25 }
 0x2d8   :  { %v3206_v45 = vpop.f32.mrf.mxu3 }
 0x2d9   :  { %v1463_v43 = vmul.f32 %v3206_v45, %v3206_v45  ;;  %v1441_v27 = vadd.f32 %v1440_v30, %v3206_v45 }
 0x2db   :  { %v1478_v47 = vadd.f32 %v1477_v56, %v1463_v43 }
 0x2e0   :  { %v3220_v21 = vpop.f32.mrf.mxu3 }
 0x2e1   :  { %v1464_v28 = vmul.f32 %v3220_v21, %v3220_v21  ;;  %v1442_v54 = vadd.f32 %v1441_v27, %v3220_v21 }
 0x2e3   :  { %v1479_v62 = vadd.f32 %v1478_v47, %v1464_v28 }
 0x2e8   :  { %v3234_v38 = vpop.f32.mrf.mxu3 }
 0x2e9   :  { %v1465_v58 = vmul.f32 %v3234_v38, %v3234_v38  ;;  %v1443_v57 = vadd.f32 %v1442_v54, %v3234_v38 }
 0x2eb   :  { %v1480_v41 = vadd.f32 %v1479_v62, %v1465_v58 }
 0x2f0   :  { %v1427_v34 = vpop.f32.mrf.mxu3 }
 0x2f1   :  { %v1444_v8 = vadd.f32 %v1443_v57, %v1427_v34  ;;  %v1466_v46 = vmul.f32 %v1427_v34, %v1427_v34 }
 0x2f3   :  { %v1445_v31 = vrot.slane %v1444_v8, 4  ;;  %v1481_v3 = vadd.f32 %v1480_v41, %v1466_v46 }
 0x2f5   :  { %v1446_v2 = vadd.f32 %v1445_v31, %v1444_v8  ;;  %v1482_v44 = vrot.slane %v1481_v3, 4 }
 0x2f7   :  { %v1447_v22 = vrot.slane %v1446_v2, 2  ;;  %v1483_v33 = vadd.f32 %v1482_v44, %v1481_v3 }
 0x2f9   :  { %v1448_v37 = vadd.f32 %v1447_v22, %v1446_v2  ;;  %v1484_v23 = vrot.slane %v1483_v33, 2 }
 0x2fb   :  { %v1449_v35 = vrot.slane %v1448_v37, 1  ;;  %v1485_v16 = vadd.f32 %v1484_v23, %v1483_v33 }
 0x2fd   :  { %v1450_v39 = vadd.f32 %v1449_v35, %v1448_v37  ;;  %v1486_v29 = vrot.slane %v1485_v16, 1 }
 0x2ff   :  { %v1487_v10 = vadd.f32 %v1486_v29, %v1485_v16  ;;  %v1488_v19 = vmul.f32 0.0078125, %v1450_v39 }
 0x301   :  { %v1489_v61 = vmul.f32 0.0078125, %v1487_v10  ;;  %v1490_v51 = vmul.f32 %v1488_v19, %v1488_v19 }
 0x303   :  { %v1491_v5 = vsub.f32 %v1489_v61, %v1490_v51 }
 0x305   :  { %v1492_v9 = vadd.f32 1e-05, %v1491_v5 }
 0x307   :  { %2372 = vrsqrt.f32 %v1492_v9  ;;  %vm1499_vm4 = vweird.f32 %v1492_v9 }
 0x30d   :  { %v2373_v36 = vpop.eup %2372 }
 0x30e   :  { %v1494_v15 = vmul.f32 %v2373_v36, %v1492_v9  ;;  %vm1500_vm3 = vweird.f32 %v2373_v36 }
 0x30f   :  { %vm1501_vm5 = vmor %vm1499_vm4, %vm1500_vm3 }
 0x310   :  { %v1495_v24 = vmul.f32 %v2373_v36, %v1494_v15 }
 0x312   :  { %v1496_v18 = vmul.f32 0.5, %v1495_v24 }
 0x314   :  { %v1497_v55 = vsub.f32 1.5, %v1496_v18 }
 0x316   :  { %v1498_v49 = vmul.f32 %v2373_v36, %v1497_v55 }
 0x318   :  { %v1502_v48 = vsel %vm1501_vm5, %v2373_v36, %v1498_v49 }
 0x319   :  { %v1503_v13 = vmul.f32 %v1502_v48, %v1331_v6 }
 0x31b   :  { %v1504_v50 = vmul.f32 %v1503_v13, %v1488_v19  ;;  %v1507_v12 = vperm.slane %v1503_v13, 0 }
 0x31d   :  { %v1505_v25 = vsub.f32 %v1332_v60, %v1504_v50  ;;  %v1524_v20 = vmul.f32 %v1507_v12, %v1427_v34  ;;  %v1509_v43 = vmul.f32 %v1507_v12, %v3156_v42  ;;  %v1510_v56 = vmul.f32 %v1507_v12, %v3158_v0 }
 0x31e   :  { %v1517_v62 = vmul.f32 %v1507_v12, %v3184_v40  ;;  %v1518_v57 = vmul.f32 %v1507_v12, %v3186_v14  ;;  %v1519_v41 = vmul.f32 %v1507_v12, %v3191_v53  ;;  %v1520_v34 = vmul.f32 %v1507_v12, %v3193_v11 }
 0x31f   :  { %v1526_v30 = vperm.slane %v1505_v25, 0  ;;  %v1521_v42 = vmul.f32 %v1507_v12, %v3206_v45  ;;  %v1522_v22 = vmul.f32 %v1507_v12, %v3220_v21  ;;  %v1523_v14 = vmul.f32 %v1507_v12, %v3234_v38 }
 0x320   :  { %v1511_v11 = vmul.f32 %v1507_v12, %v3163_v1  ;;  %v1512_v45 = vmul.f32 %v1507_v12, %v3165_v52  ;;  %v1513_v17 = vmul.f32 %v1507_v12, %v3170_v26  ;;  %v1514_v63 = vmul.f32 %v1507_v12, %v3172_v4  ;;  %v2369_v26 = vld [vmem:[%s3335_s8] ss:$0 sm:$0xff] }
 0x321   :  { %v1543_v27 = vadd.f32 %v1526_v30, %v1524_v20  ;;  %v1528_v28 = vadd.f32 %v1526_v30, %v1509_v43  ;;  %v1529_v47 = vadd.f32 %v1526_v30, %v1510_v56  ;;  %v1536_v46 = vadd.f32 %v1526_v30, %v1517_v62 }
 0x322   :  { %v1537_v31 = vadd.f32 %v1526_v30, %v1518_v57  ;;  %v1538_v3 = vadd.f32 %v1526_v30, %v1519_v41  ;;  %v1539_v44 = vadd.f32 %v1526_v30, %v1520_v34  ;;  %v1540_v40 = vadd.f32 %v1526_v30, %v1521_v42 }
 0x323   :  { %v1544_v54 = vmax.f32 %v1528_v28, 0.0  ;;  %v1545_v58 = vmax.f32 %v1529_v47, 0.0  ;;  %v1552_v0 = vmax.f32 %v1536_v46, 0.0  ;;  %v1541_v23 = vadd.f32 %v1526_v30, %v1522_v22 }
 0x324   :  { %v1553_v2 = vmax.f32 %v1537_v31, 0.0  ;;  %v1554_v33 = vmax.f32 %v1538_v3, 0.0  ;;  %v1555_v53 = vmax.f32 %v1539_v44, 0.0  ;;  %v1559_v35 = vmax.f32 %v1543_v27, 0.0 }
 0x325   :  { %v1560_v8 = vpack.c.bf16 %v1545_v58, %v1544_v54  ;;  %v1556_v16 = vmax.f32 %v1540_v40, 0.0  ;;  %v1542_v39 = vadd.f32 %v1526_v30, %v1523_v14  ;;  %v1557_v10 = vmax.f32 %v1541_v23, 0.0 }
 0x326   :  { %v1564_v37 = vpack.c.bf16 %v1553_v2, %v1552_v0  ;;  %v1565_v29 = vpack.c.bf16 %v1555_v53, %v1554_v33  ;;  %v1530_v61 = vadd.f32 %v1526_v30, %v1511_v11  ;;  %v1531_v51 = vadd.f32 %v1526_v30, %v1512_v45 }
 0x327   :  { %1644 = vmatmul.bf16.vlgmr.msra.gmra.mxu0 %v1560_v8  ;;  %v1558_v19 = vmax.f32 %v1542_v39, 0.0  ;;  %v1566_v21 = vpack.c.bf16 %v1557_v10, %v1556_v16  ;;  %v1532_v36 = vadd.f32 %v1526_v30, %v1513_v17  ;;  %v1533_v15 = vadd.f32 %v1526_v30, %v1514_v63 }
 0x328   :  { %v1546_v7 = vmax.f32 %v1530_v61, 0.0  ;;  %v1547_v9 = vmax.f32 %v1531_v51, 0.0  ;;  %v1515_v18 = vmul.f32 %v1507_v12, %v3177_v32  ;;  %v1516_v55 = vmul.f32 %v1507_v12, %v3179_v59 }
 0x329   :  { %v1567_v5 = vpack.c.bf16 %v1559_v35, %v1558_v19  ;;  %v1548_v1 = vmax.f32 %v1532_v36, 0.0  ;;  %v1549_v24 = vmax.f32 %v1533_v15, 0.0 }
 0x32a   :  { %v1561_v38 = vpack.c.bf16 %v1547_v9, %v1546_v7  ;;  %v1534_v6 = vadd.f32 %v1526_v30, %v1515_v18  ;;  %v1535_v49 = vadd.f32 %v1526_v30, %v1516_v55 }
 0x32b   :  { %v1562_v52 = vpack.c.bf16 %v1549_v24, %v1548_v1 }
 0x32c   :  { %v1550_v48 = vmax.f32 %v1534_v6, 0.0  ;;  %v1551_v13 = vmax.f32 %v1535_v49, 0.0 }
 0x32e   :  { %v1563_v60 = vpack.c.bf16 %v1551_v13, %v1550_v48 }
 0x337   :  { %1649 = vmatmul.bf16.gmra.mxu0 %v1561_v38 }
 0x347   :  { %1654 = vmatmul.bf16.gmra.mxu0 %v1562_v52 }
 0x357   :  { %1659 = vmatmul.bf16.gmra.mxu0 %v1563_v60 }
 0x367   :  { %1664 = vmatmul.bf16.gmra.mxu0 %v1564_v37 }
 0x377   :  { %1669 = vmatmul.bf16.gmra.mxu0 %v1565_v29 }
 0x387   :  { %1674 = vmatmul.bf16.gmra.mxu0 %v1566_v21 }
 0x397   :  { %1679 = vmatmul.bf16.gmra.mxu0 %v1567_v5 }
 0x3a4   :  { %v1645_v4 = vpop.f32.mrf.mxu0 }
 0x3a5   :  { %v1646_v50 = vadd.f32 %v2369_v26, %v1645_v4 }
 0x3a7   :  { %1685 = vst [vmem:[%s3336_s9] sm:$0xff] %v1646_v50 }
 0x3ac   :  { %v1647_v32 = vpop.f32.mrf.mxu0 }
 0x3ad   :  { %v1648_v59 = vadd.f32 %v2369_v26, %v1647_v32 }
 0x3af   :  { %1686 = vst [vmem:[%s3336_s9 + $0x8] sm:$0xff] %v1648_v59 }
 0x3b4   :  { %v1650_v12 = vpop.f32.mrf.mxu0 }
 0x3b5   :  { %v1651_v25 = vadd.f32 %v2369_v26, %v1650_v12 }
 0x3b7   :  { %1687 = vst [vmem:[%s3336_s9 + $0x10] sm:$0xff] %v1651_v25 }
 0x3bc   :  { %v1652_v20 = vpop.f32.mrf.mxu0 }
 0x3bd   :  { %v1653_v30 = vadd.f32 %v2369_v26, %v1652_v20 }
 0x3bf   :  { %1688 = vst [vmem:[%s3336_s9 + $0x18] sm:$0xff] %v1653_v30 }
 0x3c4   :  { %v1655_v43 = vpop.f32.mrf.mxu0 }
 0x3c5   :  { %v1656_v56 = vadd.f32 %v2369_v26, %v1655_v43 }
 0x3c7   :  { %1689 = vst [vmem:[%s3336_s9 + $0x20] sm:$0xff] %v1656_v56 }
 0x3cc   :  { %v1657_v27 = vpop.f32.mrf.mxu0 }
 0x3cd   :  { %v1658_v28 = vadd.f32 %v2369_v26, %v1657_v27 }
 0x3cf   :  { %1690 = vst [vmem:[%s3336_s9 + $0x28] sm:$0xff] %v1658_v28 }
 0x3d4   :  { %v1660_v47 = vpop.f32.mrf.mxu0 }
 0x3d5   :  { %v1661_v54 = vadd.f32 %v2369_v26, %v1660_v47 }
 0x3d7   :  { %1691 = vst [vmem:[%s3336_s9 + $0x30] sm:$0xff] %v1661_v54 }
 0x3dc   :  { %v1662_v58 = vpop.f32.mrf.mxu0 }
 0x3dd   :  { %v1663_v62 = vadd.f32 %v2369_v26, %v1662_v58 }
 0x3df   :  { %1692 = vst [vmem:[%s3336_s9 + $0x38] sm:$0xff] %v1663_v62 }
 0x3e4   :  { %v1665_v57 = vpop.f32.mrf.mxu0 }
 0x3e5   :  { %v1666_v41 = vadd.f32 %v2369_v26, %v1665_v57 }
 0x3e7   :  { %1693 = vst [vmem:[%s3336_s9 + $0x40] sm:$0xff] %v1666_v41 }
 0x3ec   :  { %v1667_v8 = vpop.f32.mrf.mxu0 }
 0x3ed   :  { %v1668_v46 = vadd.f32 %v2369_v26, %v1667_v8 }
 0x3ef   :  { %1694 = vst [vmem:[%s3336_s9 + $0x48] sm:$0xff] %v1668_v46 }
 0x3f4   :  { %v1670_v31 = vpop.f32.mrf.mxu0 }
 0x3f5   :  { %v1671_v34 = vadd.f32 %v2369_v26, %v1670_v31 }
 0x3f7   :  { %1695 = vst [vmem:[%s3336_s9 + $0x50] sm:$0xff] %v1671_v34 }
 0x3fc   :  { %v1672_v3 = vpop.f32.mrf.mxu0 }
 0x3fd   :  { %v1673_v42 = vadd.f32 %v2369_v26, %v1672_v3 }
 0x3ff   :  { %1696 = vst [vmem:[%s3336_s9 + $0x58] sm:$0xff] %v1673_v42 }
 0x404   :  { %v1675_v0 = vpop.f32.mrf.mxu0 }
 0x405   :  { %v1676_v2 = vadd.f32 %v2369_v26, %v1675_v0 }
 0x407   :  { %1697 = vst [vmem:[%s3336_s9 + $0x60] sm:$0xff] %v1676_v2 }
 0x40c   :  { %v1677_v44 = vpop.f32.mrf.mxu0 }
 0x40d   :  { %v1678_v22 = vadd.f32 %v2369_v26, %v1677_v44 }
 0x40f   :  { %1698 = vst [vmem:[%s3336_s9 + $0x68] sm:$0xff] %v1678_v22 }
 0x414   :  { %v1680_v33 = vpop.f32.mrf.mxu0 }
 0x415   :  { %v1681_v40 = vadd.f32 %v2369_v26, %v1680_v33 }
 0x417   :  { %1699 = vst [vmem:[%s3336_s9 + $0x70] sm:$0xff] %v1681_v40 }
 0x41c   :  { %v1682_v14 = vpop.f32.mrf.mxu0 }
 0x41d   :  { %v1683_v37 = vadd.f32 %v2369_v26, %v1682_v14 }
 0x41f   :  { %1700 = vst [vmem:[%s3336_s9 + $0x78] sm:$0xff] %v1683_v37 }

</bundles_post_ra>
